<compile_context>
chip_gen: v7x
topology: tpu7x:2x2x1
jax: 0.10.0
libtpu: 0.0.40
codegen_flags: <defaults>
</compile_context>

<pallas_src>
import jax
import jax.numpy as jnp
import numpy as np
from jax.experimental import pallas as pl
from jax.experimental.pallas import tpu as pltpu

EPS = 1e-5
# AvgPool2d(5, stride=3) on 8x8 -> 2x2 output; window p = kh*2+kw at (3*kh, 3*kw)
_WINDOWS = ((0, 0), (0, 3), (3, 0), (3, 3))
_K_TILE_MAX = 2048          # max K (=64*C) streamed per grid step (128-aligned)


def _aux_head_kernel(x_ref, wa_ref, ta_ref, wb_ref, tb_ref, wfc_ref, bfc_ref,
                     out_ref, acc_ref):
    # x_ref  : [BT, TK]        bf16  (flattened NCHW batch tile, K slice)
    # wa_ref : [TK, 512]       bf16  (AvgPool + Conv1x1 + BN1-scale, folded)
    # ta_ref : [1, 512]        f32   (BN1 shift, tiled over the 4 taps)
    # wb_ref : [512, 768]      bf16  (2x2 conv fused over taps + BN2-scale)
    # tb_ref : [1, 768]        f32   (BN2 shift)
    # wfc_ref: [768, NCLS_PAD] bf16, bfc_ref: [1, NCLS_PAD] f32
    # acc_ref: [BT, 512]       f32   VMEM accumulator over the K grid axis
    k = pl.program_id(1)

    @pl.when(k == 0)
    def _():
        acc_ref[...] = jnp.zeros_like(acc_ref)

    x = jnp.maximum(x_ref[...], 0)                       # ReLU (exact on bf16)
    acc_ref[...] += jnp.dot(x, wa_ref[...],
                            preferred_element_type=jnp.float32)

    @pl.when(k == pl.num_programs(1) - 1)
    def _():
        y1 = jnp.maximum(acc_ref[...] + ta_ref[...], 0.0)        # BN1 + ReLU (f32)
        z2 = jnp.dot(y1.astype(jnp.bfloat16), wb_ref[...],
                     preferred_element_type=jnp.float32)          # [BT, 768]
        z2 = jnp.maximum(z2 + tb_ref[...], 0.0)                   # BN2 + ReLU (f32)
        out_ref[...] = (jnp.dot(z2.astype(jnp.bfloat16), wfc_ref[...],
                                preferred_element_type=jnp.float32)
                        + bfc_ref[...])                           # Linear


def _choose_batch_tiling(n):
    """Pick the batch tile first, then pad N up to a multiple of it.

    Never degrades to tiny M tiles for awkward batch sizes, and keeps the grid
    >= 2 for N >= 256 so the "parallel" axis can use both v7x TensorCores.
    """
    n8 = -(-n // 8) * 8                    # sublane multiple
    if n8 >= 2048:
        bt = 512
    elif n8 >= 512:
        bt = 256
    elif n8 >= 256:
        bt = 128
    else:
        bt = n8                            # single tile; too small to split
    n_pad = -(-n8 // bt) * bt
    return bt, n_pad


def _choose_k_tile(K):
    """Stream the K (=64*C) reduction in bounded, 128-aligned tiles.

    Falls back to a single full-K step when K is small or not 128-divisible
    (odd C) -- still correct, just not tiled.
    """
    if K <= _K_TILE_MAX or K % 128 != 0:
        return K
    m = K // 128
    t = 1
    for cand in range(1, _K_TILE_MAX // 128 + 1):
        if m % cand == 0:
            t = cand
    return 128 * t


def aux_head_forward(x_nchw, kparams):
    wa, ta, wb, tb, wfc, bfc, num_classes = kparams
    n, c, h, w = x_nchw.shape
    assert (h, w) == (8, 8), "AuxiliaryHeadCIFAR assumes 8x8 spatial input"
    K = 64 * c
    ncls_pad = wfc.shape[1]
    assert wa.shape == (K, 4 * 128)

    # NCHW flattens directly (free view) to [N, C*64]; wa's rows are already in
    # (c*64 + h*8 + w) order, so no NHWC transpose pass over HBM. bf16 halves
    # the activation DMA into the kernel.
    x_flat = x_nchw.reshape(n, K).astype(jnp.bfloat16)

    bt, n_pad = _choose_batch_tiling(n)
    if n_pad != n:
        x_flat = jnp.pad(x_flat, ((0, n_pad - n), (0, 0)))

    tk = _choose_k_tile(K)
    k_tiles = K // tk
    n_tiles = n_pad // bt

    def const2d(arr):
        return pl.BlockSpec(arr.shape, lambda i, k: (0, 0))

    flops = 2 * n_pad * (K * 512 + 512 * 768 + 768 * ncls_pad)
    wa_streams = n_tiles if k_tiles > 1 else 1
    bytes_accessed = (x_flat.size * 2 + wa.size * 2 * wa_streams
                      + wb.size * 2 + wfc.size * 2
                      + (ta.size + tb.size + bfc.size) * 4
                      + n_pad * ncls_pad * 4)

    out = pl.pallas_call(
        _aux_head_kernel,
        out_shape=jax.ShapeDtypeStruct((n_pad, ncls_pad), jnp.float32),
        grid=(n_tiles, k_tiles),
        in_specs=[
            pl.BlockSpec((bt, tk), lambda i, k: (i, k)),
            pl.BlockSpec((tk, 4 * 128), lambda i, k: (k, 0)),
            const2d(ta), const2d(wb), const2d(tb), const2d(wfc), const2d(bfc),
        ],
        out_specs=pl.BlockSpec((bt, ncls_pad), lambda i, k: (i, 0)),
        scratch_shapes=[pltpu.VMEM((bt, 4 * 128), jnp.float32)],
        compiler_params=pltpu.CompilerParams(
            dimension_semantics=("parallel", "arbitrary"),
            vmem_limit_bytes=32 * 1024 * 1024),
        cost_estimate=pl.CostEstimate(flops=int(flops), transcendentals=0,
                                      bytes_accessed=int(bytes_accessed)),
    )(x_flat, wa, ta, wb, tb, wfc, bfc)
    return out[:n, :num_classes]


def init_params(key, C, num_classes):
    """Deterministic synthetic parameters in PyTorch shapes."""
    ks = jax.random.split(key, 14)
    w1_pt = jax.random.normal(ks[0], (128, C, 1, 1), jnp.float32) / jnp.sqrt(C)
    w2_pt = jax.random.normal(ks[1], (768, 128, 2, 2), jnp.float32) / jnp.sqrt(128 * 4)
    wfc_pt = jax.random.normal(ks[2], (num_classes, 768), jnp.float32) / jnp.sqrt(768)
    bfc = 0.01 * jax.random.normal(ks[3], (num_classes,), jnp.float32)

    g1 = 1.0 + 0.1 * jax.random.normal(ks[4], (128,), jnp.float32)
    b1 = 0.1 * jax.random.normal(ks[5], (128,), jnp.float32)
    m1 = 0.1 * jax.random.normal(ks[6], (128,), jnp.float32)
    v1 = 0.5 + jnp.abs(jax.random.normal(ks[7], (128,), jnp.float32)) * 0.5

    g2 = 1.0 + 0.1 * jax.random.normal(ks[8], (768,), jnp.float32)
    b2 = 0.1 * jax.random.normal(ks[9], (768,), jnp.float32)
    m2 = 0.1 * jax.random.normal(ks[10], (768,), jnp.float32)
    v2 = 0.5 + jnp.abs(jax.random.normal(ks[11], (768,), jnp.float32)) * 0.5

    return dict(w1_pt=w1_pt, w2_pt=w2_pt, wfc_pt=wfc_pt, bfc=bfc,
                bn1=(g1, b1, m1, v1), bn2=(g2, b2, m2, v2))


def to_kernel_params(p, C, num_classes):
    """Fold pooling / BN-scales into the weights; pad classes to 128 lanes."""
    g1, b1, m1, v1 = p["bn1"]
    g2, b2, m2, v2 = p["bn2"]
    s1 = g1 / jnp.sqrt(v1 + EPS)
    t1 = b1 - m1 * s1
    s2 = g2 / jnp.sqrt(v2 + EPS)
    t2 = b2 - m2 * s2

    # Pooling matrix: P[s, p] = 1/25 iff spatial position s is in window p.
    P = np.zeros((64, 4), np.float32)
    for pidx, (h0, w0) in enumerate(_WINDOWS):
        for hh in range(h0, h0 + 5):
            for ww in range(w0, w0 + 5):
                P[hh * 8 + ww, pidx] = 1.0 / 25.0
    P = jnp.asarray(P)

    # wa rows follow the NCHW-flattened activation column order (c*64 + h*8 + w):
    #   wa[(c*64 + s), (p*128 + o)] = P[s, p] * w1[o, c] * s1[o]
    w1s = jnp.transpose(p["w1_pt"][:, :, 0, 0], (1, 0)) * s1[None, :]   # [C, 128]
    wa = jnp.einsum('sp,co->cspo', P, w1s).reshape(64 * C, 4 * 128)
    ta = jnp.tile(t1, 4)[None, :]                                        # [1, 512]

    # wb[(p*128 + o), d] = w2[d, o, kh, kw] * s2[d],  p = kh*2 + kw
    wb = jnp.transpose(p["w2_pt"], (2, 3, 1, 0)).reshape(4 * 128, 768)
    wb = wb * s2[None, :]
    tb = t2[None, :]                                                     # [1, 768]

    ncls_pad = -(-num_classes // 128) * 128
    wfc = jnp.zeros((768, ncls_pad), jnp.float32)
    wfc = wfc.at[:, :num_classes].set(jnp.transpose(p["wfc_pt"], (1, 0)))
    bfc = jnp.zeros((1, ncls_pad), jnp.float32)
    bfc = bfc.at[0, :num_classes].set(p["bfc"])

    return (wa.astype(jnp.bfloat16), ta.astype(jnp.float32),
            wb.astype(jnp.bfloat16), tb.astype(jnp.float32),
            wfc.astype(jnp.bfloat16), bfc.astype(jnp.float32), num_classes)


def reference_forward(x_nchw, p):
    """Pure-JAX f32 reference mirroring the PyTorch forward (eval-mode BN)."""
    g1, b1, m1, v1 = p["bn1"]
    g2, b2, m2, v2 = p["bn2"]
    x = jnp.maximum(x_nchw.astype(jnp.float32), 0.0)
    pools = []
    for h0 in (0, 3):
        for w0 in (0, 3):
            pools.append(jnp.mean(x[:, :, h0:h0 + 5, w0:w0 + 5], axis=(2, 3)))
    pooled = jnp.stack(pools, axis=-1).reshape(x.shape[0], x.shape[1], 2, 2)
    y1 = jnp.einsum('nchw,oc->nohw', pooled, p["w1_pt"][:, :, 0, 0])
    y1 = ((y1 - m1[None, :, None, None]) / jnp.sqrt(v1 + EPS)[None, :, None, None]
          * g1[None, :, None, None] + b1[None, :, None, None])
    y1 = jnp.maximum(y1, 0.0)
    z2 = jnp.einsum('nchw,ochw->no', y1, p["w2_pt"])
    z2 = (z2 - m2[None, :]) / jnp.sqrt(v2 + EPS)[None, :] * g2[None, :] + b2[None, :]
    z2 = jnp.maximum(z2, 0.0)
    return z2 @ p["wfc_pt"].T + p["bfc"][None, :]


if __name__ == "__main__":
    N, C, H, W = 2, 16, 8, 8          # module assumes 8x8 spatial input
    num_classes = 10

    key = jax.random.PRNGKey(0)
    kx, kp = jax.random.split(key)
    x = jax.random.normal(kx, (N, C, H, W), jnp.float32)   # NCHW, like PyTorch

    params = init_params(kp, C, num_classes)
    kparams = to_kernel_params(params, C, num_classes)

    out = aux_head_forward(x, kparams)
    out = jax.block_until_ready(out)

    ref = reference_forward(x, params)
    assert out.shape == (N, num_classes)
    assert bool(jnp.all(jnp.isfinite(out)))
    assert bool(jnp.allclose(out, ref, atol=5e-2, rtol=5e-2)), "mismatch vs reference"

    print("KERNEL_OK")
</pallas_src>

<mosaic_0001>
module attributes {stable_mosaic.version = 11 : i64} {
  func.func @_aux_head_kernel(%arg0: i32, %arg1: i32, %arg2: memref<8x1024xbf16, #tpu.memory_space<vmem>>, %arg3: memref<1024x512xbf16, #tpu.memory_space<vmem>>, %arg4: memref<1x512xf32, #tpu.memory_space<vmem>>, %arg5: memref<512x768xbf16, #tpu.memory_space<vmem>>, %arg6: memref<1x768xf32, #tpu.memory_space<vmem>>, %arg7: memref<768x128xbf16, #tpu.memory_space<vmem>>, %arg8: memref<1x128xf32, #tpu.memory_space<vmem>>, %arg9: memref<8x128xf32, #tpu.memory_space<vmem>>, %arg10: memref<8x512xf32, #tpu.memory_space<vmem>>) attributes {dimension_semantics = [#tpu.dimension_semantics<parallel>, #tpu.dimension_semantics<arbitrary>], iteration_bounds = array<i64: 1, 1>, scalar_prefetch = 0 : i64, scratch_operands = 1 : i64, tpu.core_type = #tpu.core_type<tc>, window_params = [{transform_indices = @transform_0, window_bounds = array<i64: 8, 1024>}, {transform_indices = @transform_1, window_bounds = array<i64: 1024, 512>}, {pipeline_mode = #tpu.pipeline_mode<synchronous>, transform_indices = @transform_2, window_bounds = array<i64: 1, 512>}, {pipeline_mode = #tpu.pipeline_mode<synchronous>, transform_indices = @transform_3, window_bounds = array<i64: 512, 768>}, {pipeline_mode = #tpu.pipeline_mode<synchronous>, transform_indices = @transform_4, window_bounds = array<i64: 1, 768>}, {pipeline_mode = #tpu.pipeline_mode<synchronous>, transform_indices = @transform_5, window_bounds = array<i64: 768, 128>}, {pipeline_mode = #tpu.pipeline_mode<synchronous>, transform_indices = @transform_6, window_bounds = array<i64: 1, 128>}, {transform_indices = @transform_7, window_bounds = array<i64: 8, 128>}]} {
    %c0_i32 = arith.constant 0 : i32
    %0 = arith.cmpi eq, %arg1, %c0_i32 : i32
    %1 = arith.extui %0 : i1 to i32
    %c0_i32_0 = arith.constant 0 : i32
    %2 = arith.cmpi ne, %1, %c0_i32_0 : i32
    scf.if %2 {
      %cst_11 = arith.constant 0.000000e+00 : f32
      %14 = vector.broadcast %cst_11 : f32 to vector<8x512xf32>
      %c0_12 = arith.constant 0 : index
      %c0_13 = arith.constant 0 : index
      %15 = vector.load %arg10[%c0_12, %c0_13] : memref<8x512xf32, #tpu.memory_space<vmem>>, vector<8x512xf32>
      tpu.vector_store %arg10[%c0_12, %c0_13], %14 {strides = array<i32>} : memref<8x512xf32, #tpu.memory_space<vmem>>, vector<8x512xf32>,
    } else {
    }
    %c0 = arith.constant 0 : index
    %c0_1 = arith.constant 0 : index
    %3 = vector.load %arg2[%c0, %c0_1] : memref<8x1024xbf16, #tpu.memory_space<vmem>>, vector<8x1024xbf16>
    %cst = arith.constant 0.000000e+00 : bf16
    %4 = vector.broadcast %cst : bf16 to vector<8x1024xbf16>
    %5 = arith.maximumf %3, %4 : vector<8x1024xbf16>
    %c0_2 = arith.constant 0 : index
    %c0_3 = arith.constant 0 : index
    %6 = vector.load %arg10[%c0_2, %c0_3] : memref<8x512xf32, #tpu.memory_space<vmem>>, vector<8x512xf32>
    %c0_4 = arith.constant 0 : index
    %c0_5 = arith.constant 0 : index
    %7 = vector.load %arg3[%c0_4, %c0_5] : memref<1024x512xbf16, #tpu.memory_space<vmem>>, vector<1024x512xbf16>
    %cst_6 = arith.constant dense<0.000000e+00> : vector<8x512xf32>
    %8 = tpu.matmul %5, %7, %cst_6 {dimension_numbers = #tpu.dot_dimension_numbers<[1], [0], [0], [1], [0, 0, 1, 1], [], []>} : vector<8x1024xbf16>, vector<1024x512xbf16>, vector<8x512xf32> -> vector<8x512xf32>
    %9 = arith.addf %6, %8 : vector<8x512xf32>
    %c0_7 = arith.constant 0 : index
    %c0_8 = arith.constant 0 : index
    %10 = vector.load %arg10[%c0_7, %c0_8] : memref<8x512xf32, #tpu.memory_space<vmem>>, vector<8x512xf32>
    tpu.vector_store %arg10[%c0_7, %c0_8], %9 {strides = array<i32>} : memref<8x512xf32, #tpu.memory_space<vmem>>, vector<8x512xf32>,
    %c0_i32_9 = arith.constant 0 : i32
    %11 = arith.cmpi eq, %arg1, %c0_i32_9 : i32
    %12 = arith.extui %11 : i1 to i32
    %c0_i32_10 = arith.constant 0 : i32
    %13 = arith.cmpi ne, %12, %c0_i32_10 : i32
    scf.if %13 {
      %c0_11 = arith.constant 0 : index
      %c0_12 = arith.constant 0 : index
      %14 = vector.load %arg10[%c0_11, %c0_12] : memref<8x512xf32, #tpu.memory_space<vmem>>, vector<8x512xf32>
      %c0_13 = arith.constant 0 : index
      %c0_14 = arith.constant 0 : index
      %15 = vector.load %arg4[%c0_13, %c0_14] : memref<1x512xf32, #tpu.memory_space<vmem>>, vector<1x512xf32>
      %16 = vector.broadcast %15 : vector<1x512xf32> to vector<8x512xf32>
      %17 = arith.addf %14, %16 : vector<8x512xf32>
      %cst_15 = arith.constant 0.000000e+00 : f32
      %18 = vector.broadcast %cst_15 : f32 to vector<8x512xf32>
      %19 = arith.maximumf %17, %18 : vector<8x512xf32>
      %20 = arith.truncf %19 : vector<8x512xf32> to vector<8x512xbf16>
      %c0_16 = arith.constant 0 : index
      %c0_17 = arith.constant 0 : index
      %21 = vector.load %arg5[%c0_16, %c0_17] : memref<512x768xbf16, #tpu.memory_space<vmem>>, vector<512x768xbf16>
      %cst_18 = arith.constant dense<0.000000e+00> : vector<8x768xf32>
      %22 = tpu.matmul %20, %21, %cst_18 {dimension_numbers = #tpu.dot_dimension_numbers<[1], [0], [0], [1], [0, 0, 1, 1], [], []>} : vector<8x512xbf16>, vector<512x768xbf16>, vector<8x768xf32> -> vector<8x768xf32>
      %c0_19 = arith.constant 0 : index
      %c0_20 = arith.constant 0 : index
      %23 = vector.load %arg6[%c0_19, %c0_20] : memref<1x768xf32, #tpu.memory_space<vmem>>, vector<1x768xf32>
      %24 = vector.broadcast %23 : vector<1x768xf32> to vector<8x768xf32>
      %25 = arith.addf %22, %24 : vector<8x768xf32>
      %cst_21 = arith.constant 0.000000e+00 : f32
      %26 = vector.broadcast %cst_21 : f32 to vector<8x768xf32>
      %27 = arith.maximumf %25, %26 : vector<8x768xf32>
      %28 = arith.truncf %27 : vector<8x768xf32> to vector<8x768xbf16>
      %c0_22 = arith.constant 0 : index
      %c0_23 = arith.constant 0 : index
      %29 = vector.load %arg7[%c0_22, %c0_23] : memref<768x128xbf16, #tpu.memory_space<vmem>>, vector<768x128xbf16>
      %cst_24 = arith.constant dense<0.000000e+00> : vector<8x128xf32>
      %30 = tpu.matmul %28, %29, %cst_24 {dimension_numbers = #tpu.dot_dimension_numbers<[1], [0], [0], [1], [0, 0, 1, 1], [], []>} : vector<8x768xbf16>, vector<768x128xbf16>, vector<8x128xf32> -> vector<8x128xf32>
      %c0_25 = arith.constant 0 : index
      %c0_26 = arith.constant 0 : index
      %31 = vector.load %arg8[%c0_25, %c0_26] : memref<1x128xf32, #tpu.memory_space<vmem>>, vector<1x128xf32>
      %32 = vector.broadcast %31 : vector<1x128xf32> to vector<8x128xf32>
      %33 = arith.addf %30, %32 : vector<8x128xf32>
      %c0_27 = arith.constant 0 : index
      %c0_28 = arith.constant 0 : index
      %34 = vector.load %arg9[%c0_27, %c0_28] : memref<8x128xf32, #tpu.memory_space<vmem>>, vector<8x128xf32>
      tpu.vector_store %arg9[%c0_27, %c0_28], %33 {strides = array<i32>} : memref<8x128xf32, #tpu.memory_space<vmem>>, vector<8x128xf32>,
    } else {
    }
    return
  }
  func.func @transform_0(%arg0: i32, %arg1: i32) -> (i32, i32) {
    %c0_i32 = arith.constant 0 : i32
    return %arg0, %arg1 : i32, i32
  }
  func.func @transform_1(%arg0: i32, %arg1: i32) -> (i32, i32) {
    %c0_i32 = arith.constant 0 : i32
    %c0_i32_0 = arith.constant 0 : i32
    return %arg1, %c0_i32 : i32, i32
  }
  func.func @transform_2(%arg0: i32, %arg1: i32) -> (i32, i32) {
    %c0_i32 = arith.constant 0 : i32
    %c0_i32_0 = arith.constant 0 : i32
    %c0_i32_1 = arith.constant 0 : i32
    return %c0_i32, %c0_i32_0 : i32, i32
  }
  func.func @transform_3(%arg0: i32, %arg1: i32) -> (i32, i32) {
    %c0_i32 = arith.constant 0 : i32
    %c0_i32_0 = arith.constant 0 : i32
    %c0_i32_1 = arith.constant 0 : i32
    return %c0_i32, %c0_i32_0 : i32, i32
  }
  func.func @transform_4(%arg0: i32, %arg1: i32) -> (i32, i32) {
    %c0_i32 = arith.constant 0 : i32
    %c0_i32_0 = arith.constant 0 : i32
    %c0_i32_1 = arith.constant 0 : i32
    return %c0_i32, %c0_i32_0 : i32, i32
  }
  func.func @transform_5(%arg0: i32, %arg1: i32) -> (i32, i32) {
    %c0_i32 = arith.constant 0 : i32
    %c0_i32_0 = arith.constant 0 : i32
    %c0_i32_1 = arith.constant 0 : i32
    return %c0_i32, %c0_i32_0 : i32, i32
  }
  func.func @transform_6(%arg0: i32, %arg1: i32) -> (i32, i32) {
    %c0_i32 = arith.constant 0 : i32
    %c0_i32_0 = arith.constant 0 : i32
    %c0_i32_1 = arith.constant 0 : i32
    return %c0_i32, %c0_i32_0 : i32, i32
  }
  func.func @transform_7(%arg0: i32, %arg1: i32) -> (i32, i32) {
    %c0_i32 = arith.constant 0 : i32
    %c0_i32_0 = arith.constant 0 : i32
    return %arg0, %c0_i32 : i32, i32
  }
}

</mosaic_0001>

<bundles_post_ra>
// kernel: tpu_custom_call.1
= control target key start
LH: loop header
LB: loop body
LE: loop exit
PB: predicated region body
PF: predicated region fallthrough
CT: control target
= control target key end

     0   :  { %12 = vsyncpa [#allocation4], 0  ;;  %s5685_s0 = inlined_call_operand.hbm [shape: bf16[8,1024], index: 0, kind: input, shape index: {}]   ;;  %s5686_s1 = inlined_call_operand.hbm [shape: bf16[1024,512], index: 1, kind: input, shape index: {}]   ;;  %s5687_s2 = inlined_call_operand.vmem [shape: f32[1,512], index: 2, kind: input, shape index: {}]   ;;  %s5688_s3 = inlined_call_operand.hbm [shape: bf16[512,768], index: 3, kind: input, shape index: {}]   ;;  %s5689_s4 = inlined_call_operand.vmem [shape: f32[1,768], index: 4, kind: input, shape index: {}]   ;;  %s5690_s5 = inlined_call_operand.hbm [shape: bf16[768,128], index: 5, kind: input, shape index: {}]   ;;  %s5691_s6 = inlined_call_operand.vmem [shape: f32[1,128], index: 6, kind: input, shape index: {}]   ;;  %s5692_s7 = inlined_call_operand.hbm [shape: f32[8,128], index: 7, kind: output, shape index: {}]  }
   0x1   :  { %13 = vsyncpa [#allocation7], 0 }
   0x2   :  { %14 = vsyncpa [#allocation10], 0 }
   0x3   :  { %15 = vsyncpa [#allocation5], 0  ;;  %s5452_s24 = smov [#allocation6]   ;;  %s5334_s28 = scalar_lea.hbm %s5686_s1, 32768 }
   0x4   :  { %s31_s25 = sshll.u32 %s5452_s24, 4  ;;  %p5335_p0 = scmp.ne.s32.totalorder %s5686_s1, %s5334_s28  ;;  %s32_s25 = int_to_ptr.vmem [resolvable:$true] %s31_s25 }
   0x5   :  { %p5338_p1 = scmp.lt.u32.totalorder %s5334_s28, %s5686_s1 }
   0x7   :  { %p5340_p2 = pnand %p5338_p1, %p5335_p0 }
   0x9   :  { %5343 = shalt.err (!%p5340_p2)
}
   0xa   :  { %s5344_s10 = scalar_lea.vmem %s32_s25, 32768  ;;  %p5349_p4 = scmp.lt.s32.totalorder %s32_s25, %s32_s25 }
   0xb   :  { %p5345_p3 = scmp.ne.s32.totalorder %s32_s25, %s5344_s10  ;;  %p5350_p5 = scmp.lt.s32.totalorder %s5344_s10, %s5344_s10 }
   0xd   :  { %p5351_p6 = por %p5350_p5, %p5349_p4 }
   0xf   :  { %p5352_p7 = pnand %p5351_p6, %p5345_p3 }
  0x11   :  { %5355 = shalt.err (!%p5352_p7)
}
  0x12   :  { %s5453_s11 = smov 256   ;;  %s5454_s12 = smov 16  }
  0x13   :  { %37 = dma.hbm_to_vmem [thread:$0]  %s5686_s1, 32768, %s32_s25, [#allocation7], %s5453_s11, %s5453_s11, %s5454_s12  }
  0x14   :  { %s5455_s15 = smov [#allocation3]   ;;  %s5456_s17 = smov [#allocation8]  }
  0x15   :  { %s22_s16 = sshll.u32 %s5455_s15, 4  ;;  %s45_s18 = sshll.u32 %s5456_s17, 4  ;;  %s23_s16 = int_to_ptr.vmem [resolvable:$true] %s22_s16  ;;  %s46_s18 = int_to_ptr.vmem [resolvable:$true] %s45_s18 }
  0x16   :  { %s5356_s21 = scalar_lea.hbm %s5685_s0, 512 }
  0x17   :  { %p5357_p8 = scmp.ne.s32.totalorder %s5685_s0, %s5356_s21  ;;  %p5360_p9 = scmp.lt.u32.totalorder %s5356_s21, %s5685_s0 }
  0x19   :  { %p5362_p10 = pnand %p5360_p9, %p5357_p8 }
  0x1b   :  { %5365 = shalt.err (!%p5362_p10)
}
  0x1c   :  { %s5366_s1 = scalar_lea.vmem %s23_s16, 512  ;;  %p5371_p12 = scmp.lt.s32.totalorder %s23_s16, %s23_s16 }
  0x1d   :  { %p5367_p11 = scmp.ne.s32.totalorder %s23_s16, %s5366_s1  ;;  %p5372_p13 = scmp.lt.s32.totalorder %s5366_s1, %s5366_s1 }
  0x1f   :  { %p5373_p0 = por %p5372_p13, %p5371_p12 }
  0x21   :  { %p5374_p1 = pnand %p5373_p0, %p5367_p11 }
  0x23   :  { %5377 = shalt.err (!%p5374_p1)
}
  0x24   :  { %25 = dma.hbm_to_vmem [thread:$0]  %s5685_s0, 512, %s23_s16, [#allocation4]  }
  0x25   :  { %s5378_s30 = scalar_lea.hbm %s5688_s3, 24576 }
  0x26   :  { %p5379_p2 = scmp.ne.s32.totalorder %s5688_s3, %s5378_s30  ;;  %p5382_p3 = scmp.lt.u32.totalorder %s5378_s30, %s5688_s3 }
  0x28   :  { %p5384_p4 = pnand %p5382_p3, %p5379_p2 }
  0x2a   :  { %5387 = shalt.err (!%p5384_p4)
}
  0x2b   :  { %s5388_s12 = scalar_lea.vmem %s46_s18, 24576  ;;  %p5393_p6 = scmp.lt.s32.totalorder %s46_s18, %s46_s18 }
  0x2c   :  { %p5389_p5 = scmp.ne.s32.totalorder %s46_s18, %s5388_s12  ;;  %p5394_p7 = scmp.lt.s32.totalorder %s5388_s12, %s5388_s12 }
  0x2e   :  { %p5395_p8 = por %p5394_p7, %p5393_p6 }
  0x30   :  { %p5396_p9 = pnand %p5395_p8, %p5389_p5 }
  0x32   :  { %5399 = shalt.err (!%p5396_p9)
}
  0x33   :  { %s5457_s0 = smov 384   ;;  %s5458_s13 = smov 24  }
  0x34   :  { %51 = dma.hbm_to_vmem [thread:$0]  %s5688_s3, 24576, %s46_s18, [#allocation7], %s5457_s0, %s5457_s0, %s5458_s13  }
  0x35   :  { %s5459_s16 = smov [#allocation9]   ;;  %s5400_s21 = scalar_lea.hbm %s5690_s5, 6144 }
  0x36   :  { %s59_s17 = sshll.u32 %s5459_s16, 4  ;;  %p5401_p10 = scmp.ne.s32.totalorder %s5690_s5, %s5400_s21  ;;  %s60_s17 = int_to_ptr.vmem [resolvable:$true] %s59_s17 }
  0x37   :  { %p5404_p11 = scmp.lt.u32.totalorder %s5400_s21, %s5690_s5 }
  0x39   :  { %p5406_p12 = pnand %p5404_p11, %p5401_p10 }
  0x3b   :  { %5409 = shalt.err (!%p5406_p12)
}
  0x3c   :  { %s5410_s1 = scalar_lea.vmem %s60_s17, 6144  ;;  %p5415_p0 = scmp.lt.s32.totalorder %s60_s17, %s60_s17 }
  0x3d   :  { %p5411_p13 = scmp.ne.s32.totalorder %s60_s17, %s5410_s1  ;;  %p5416_p1 = scmp.lt.s32.totalorder %s5410_s1, %s5410_s1 }
  0x3f   :  { %p5417_p2 = por %p5416_p1, %p5415_p0 }
  0x41   :  { %p5418_p3 = pnand %p5417_p2, %p5411_p13 }
  0x43   :  { %5421 = shalt.err (!%p5418_p3)
}
  0x44   :  { %s5460_s3 = smov 64   ;;  %s5461_s18 = smov 4  }
  0x45   :  { %65 = dma.hbm_to_vmem [thread:$0]  %s5690_s5, 6144, %s60_s17, [#allocation10], %s5460_s3, %s5460_s3, %s5461_s18  }
  0x46   :  { %5444 = dma.done.wait [#allocation4], 512  }
  0x47   :  { %5445 = vsyncadd [#allocation4], 4294966784 }
  0x48   :  { %5446 = dma.done.wait [#allocation7], 57344  }
  0x49   :  { %5447 = vsyncadd [#allocation7], 4294909952 }
  0x4a   :  { %5448 = dma.done.wait [#allocation10], 6144  }
  0x4b   :  { %5449 = vsyncadd [#allocation10], 4294961152  ;;  %v4614_v0 = vld [vmem:[#allocation6 + $0x4] ss:$16 sps:$4 sm:$0xff]   ;;  %v4618_v2 = vld [vmem:[#allocation6] ss:$16 sps:$4 sm:$0xff]  }
  0x4c   :  { %v4616_v1 = vld [vmem:[#allocation6 + $0x204] ss:$16 sps:$4 sm:$0xff]   ;;  %1665 = vmatprep.subr.bf16.mxu0 %v4614_v0  ;;  %v4619_v3 = vld [vmem:[#allocation6 + $0x200] ss:$16 sps:$4 sm:$0xff]   ;;  %v5462_v47 = vmov 0   ;;  %v90_v49 = vld [vmem:[#allocation3 + $0x8] sm:$0xff] }
  0x4d   :  { %1706 = vmatprep.subr.bf16.mxu1 %v4616_v1  ;;  %v4620_v4 = vld [vmem:[#allocation6 + $0x24] ss:$16 sps:$4 sm:$0xff]   ;;  %1666 = vmatpush1.bf16.msra.mxu0 %v4618_v2  ;;  %v4624_v6 = vld [vmem:[#allocation6 + $0x20] ss:$16 sps:$4 sm:$0xff]   ;;  %v94_v52 = vmax.bf16 %v5462_v47, %v90_v49  ;;  %s5463_s8 = smov [#allocation11]  }
  0x4e   :  { %1707 = vmatpush1.bf16.msra.mxu1 %v4619_v3  ;;  %v4622_v5 = vld [vmem:[#allocation6 + $0x224] ss:$16 sps:$4 sm:$0xff]   ;;  %1667 = vmatprep.subr.bf16.mxu0 %v4620_v4  ;;  %v4625_v7 = vld [vmem:[#allocation6 + $0x220] ss:$16 sps:$4 sm:$0xff]   ;;  %s4002_s9 = sshll.u32 %s5463_s8, 4  ;;  %s4003_s9 = int_to_ptr.vmem [resolvable:$true] %s4002_s9 }
  0x4f   :  { %1708 = vmatprep.subr.bf16.mxu1 %v4622_v5  ;;  %v4626_v8 = vld [vmem:[#allocation6 + $0x44] ss:$16 sps:$4 sm:$0xff]   ;;  %v4630_v10 = vld [vmem:[#allocation6 + $0x40] ss:$16 sps:$4 sm:$0xff]   ;;  %v5556_v56 = vcombine.high %v94_v52, %v94_v52  ;;  %s5422_s10 = scalar_lea.vmem %s4003_s9, 128  ;;  %p5427_p5 = scmp.lt.s32.totalorder %s4003_s9, %s4003_s9 }
  0x50   :  { %v4628_v9 = vld [vmem:[#allocation6 + $0x244] ss:$16 sps:$4 sm:$0xff]   ;;  %v4631_v11 = vld [vmem:[#allocation6 + $0x240] ss:$16 sps:$4 sm:$0xff]   ;;  %p5423_p4 = scmp.ne.s32.totalorder %s4003_s9, %s5422_s10  ;;  %p5428_p6 = scmp.lt.s32.totalorder %s5422_s10, %s5422_s10 }
  0x51   :  { %1668 = vmatpush1.bf16.msra.mxu0 %v4624_v6  ;;  %v4632_v12 = vld [vmem:[#allocation6 + $0x64] ss:$16 sps:$4 sm:$0xff]   ;;  %v4636_v14 = vld [vmem:[#allocation6 + $0x60] ss:$16 sps:$4 sm:$0xff]   ;;  %1738 = vmatprep.mubr.bf16.mxu1 %v5556_v56 }
  0x52   :  { %1709 = vmatpush1.bf16.msra.mxu1 %v4625_v7  ;;  %1669 = vmatprep.subr.bf16.mxu0 %v4626_v8  ;;  %v4634_v13 = vld [vmem:[#allocation6 + $0x264] ss:$16 sps:$4 sm:$0xff]   ;;  %v4637_v15 = vld [vmem:[#allocation6 + $0x260] ss:$16 sps:$4 sm:$0xff]   ;;  %p5429_p7 = por %p5428_p6, %p5427_p5 }
  0x53   :  { %1710 = vmatprep.subr.bf16.mxu1 %v4628_v9  ;;  %v4638_v16 = vld [vmem:[#allocation6 + $0x84] ss:$16 sps:$4 sm:$0xff]   ;;  %v4642_v18 = vld [vmem:[#allocation6 + $0x80] ss:$16 sps:$4 sm:$0xff]  }
  0x54   :  { %v4640_v17 = vld [vmem:[#allocation6 + $0x284] ss:$16 sps:$4 sm:$0xff]   ;;  %v4643_v19 = vld [vmem:[#allocation6 + $0x280] ss:$16 sps:$4 sm:$0xff]   ;;  %p5430_p8 = pnand %p5429_p7, %p5423_p4 }
  0x55   :  { %1670 = vmatpush1.bf16.msra.mxu0 %v4630_v10  ;;  %v4644_v20 = vld [vmem:[#allocation6 + $0xa4] ss:$16 sps:$4 sm:$0xff]   ;;  %v4648_v22 = vld [vmem:[#allocation6 + $0xa0] ss:$16 sps:$4 sm:$0xff]   ;;  %v5562_v10 = vcombine.low %v94_v52, %v94_v52 }
  0x56   :  { %1711 = vmatpush1.bf16.msra.mxu1 %v4631_v11  ;;  %1671 = vmatprep.subr.bf16.mxu0 %v4632_v12  ;;  %v4646_v21 = vld [vmem:[#allocation6 + $0x2a4] ss:$16 sps:$4 sm:$0xff]   ;;  %v4649_v23 = vld [vmem:[#allocation6 + $0x2a0] ss:$16 sps:$4 sm:$0xff]  }
  0x57   :  { %1712 = vmatprep.subr.bf16.mxu1 %v4634_v13  ;;  %v4650_v24 = vld [vmem:[#allocation6 + $0xc4] ss:$16 sps:$4 sm:$0xff]   ;;  %v4654_v26 = vld [vmem:[#allocation6 + $0xc0] ss:$16 sps:$4 sm:$0xff]  }
  0x58   :  { %v4652_v25 = vld [vmem:[#allocation6 + $0x2c4] ss:$16 sps:$4 sm:$0xff]   ;;  %v4655_v27 = vld [vmem:[#allocation6 + $0x2c0] ss:$16 sps:$4 sm:$0xff]  }
  0x59   :  { %1672 = vmatpush1.bf16.msra.mxu0 %v4636_v14  ;;  %v4656_v28 = vld [vmem:[#allocation6 + $0xe4] ss:$16 sps:$4 sm:$0xff]   ;;  %v4660_v30 = vld [vmem:[#allocation6 + $0xe0] ss:$16 sps:$4 sm:$0xff]  }
  0x5a   :  { %1713 = vmatpush1.bf16.msra.mxu1 %v4637_v15  ;;  %1673 = vmatprep.subr.bf16.mxu0 %v4638_v16  ;;  %v4658_v29 = vld [vmem:[#allocation6 + $0x2e4] ss:$16 sps:$4 sm:$0xff]   ;;  %v4661_v31 = vld [vmem:[#allocation6 + $0x2e0] ss:$16 sps:$4 sm:$0xff]  }
  0x5b   :  { %1714 = vmatprep.subr.bf16.mxu1 %v4640_v17  ;;  %v4662_v32 = vld [vmem:[#allocation6 + $0x104] ss:$16 sps:$4 sm:$0xff]   ;;  %v4666_v34 = vld [vmem:[#allocation6 + $0x100] ss:$16 sps:$4 sm:$0xff]  }
  0x5c   :  { %v4664_v33 = vld [vmem:[#allocation6 + $0x304] ss:$16 sps:$4 sm:$0xff]   ;;  %v4667_v35 = vld [vmem:[#allocation6 + $0x300] ss:$16 sps:$4 sm:$0xff]  }
  0x5d   :  { %1674 = vmatpush1.bf16.msra.mxu0 %v4642_v18  ;;  %v4668_v36 = vld [vmem:[#allocation6 + $0x124] ss:$16 sps:$4 sm:$0xff]   ;;  %v4672_v38 = vld [vmem:[#allocation6 + $0x120] ss:$16 sps:$4 sm:$0xff]  }
  0x5e   :  { %1715 = vmatpush1.bf16.msra.mxu1 %v4643_v19  ;;  %1675 = vmatprep.subr.bf16.mxu0 %v4644_v20  ;;  %v4670_v37 = vld [vmem:[#allocation6 + $0x324] ss:$16 sps:$4 sm:$0xff]   ;;  %v4673_v39 = vld [vmem:[#allocation6 + $0x320] ss:$16 sps:$4 sm:$0xff]  }
  0x5f   :  { %1716 = vmatprep.subr.bf16.mxu1 %v4646_v21  ;;  %v4674_v40 = vld [vmem:[#allocation6 + $0x144] ss:$16 sps:$4 sm:$0xff]   ;;  %v4678_v42 = vld [vmem:[#allocation6 + $0x140] ss:$16 sps:$4 sm:$0xff]  }
  0x60   :  { %v4676_v41 = vld [vmem:[#allocation6 + $0x344] ss:$16 sps:$4 sm:$0xff]   ;;  %v4679_v43 = vld [vmem:[#allocation6 + $0x340] ss:$16 sps:$4 sm:$0xff]  }
  0x61   :  { %1676 = vmatpush1.bf16.msra.mxu0 %v4648_v22  ;;  %v4680_v44 = vld [vmem:[#allocation6 + $0x164] ss:$16 sps:$4 sm:$0xff]   ;;  %v4684_v50 = vld [vmem:[#allocation6 + $0x160] ss:$16 sps:$4 sm:$0xff]  }
  0x62   :  { %1717 = vmatpush1.bf16.msra.mxu1 %v4649_v23  ;;  %1677 = vmatprep.subr.bf16.mxu0 %v4650_v24  ;;  %v4682_v45 = vld [vmem:[#allocation6 + $0x364] ss:$16 sps:$4 sm:$0xff]   ;;  %v4685_v51 = vld [vmem:[#allocation6 + $0x360] ss:$16 sps:$4 sm:$0xff]  }
  0x63   :  { %1718 = vmatprep.subr.bf16.mxu1 %v4652_v25  ;;  %v89_v46 = vld [vmem:[#allocation3] sm:$0xff] }
  0x64   :  { %v93_v48 = vmax.bf16 %v5462_v47, %v89_v46  ;;  %v4686_v53 = vld [vmem:[#allocation6 + $0x184] ss:$16 sps:$4 sm:$0xff]   ;;  %v4690_v57 = vld [vmem:[#allocation6 + $0x180] ss:$16 sps:$4 sm:$0xff]  }
  0x65   :  { %1678 = vmatpush1.bf16.msra.mxu0 %v4654_v26  ;;  %v4688_v54 = vld [vmem:[#allocation6 + $0x384] ss:$16 sps:$4 sm:$0xff]   ;;  %v4691_v58 = vld [vmem:[#allocation6 + $0x380] ss:$16 sps:$4 sm:$0xff]  }
  0x66   :  { %1719 = vmatpush1.bf16.msra.mxu1 %v4655_v27  ;;  %1679 = vmatprep.subr.bf16.mxu0 %v4656_v28  ;;  %v5554_v55 = vcombine.high %v93_v48, %v93_v48  ;;  %v4692_v59 = vld [vmem:[#allocation6 + $0x1a4] ss:$16 sps:$4 sm:$0xff]   ;;  %v4696_v61 = vld [vmem:[#allocation6 + $0x1a0] ss:$16 sps:$4 sm:$0xff]   ;;  %v5560_v9 = vcombine.low %v93_v48, %v93_v48 }
  0x67   :  { %1720 = vmatprep.subr.bf16.mxu1 %v4658_v29  ;;  %v4694_v60 = vld [vmem:[#allocation6 + $0x3a4] ss:$16 sps:$4 sm:$0xff]   ;;  %v4697_v62 = vld [vmem:[#allocation6 + $0x3a0] ss:$16 sps:$4 sm:$0xff]  }
  0x68   :  { %1697 = vmatprep.mubr.bf16.mxu0 %v5554_v55  ;;  %v4698_v63 = vld [vmem:[#allocation6 + $0x1c4] ss:$16 sps:$4 sm:$0xff]   ;;  %v4702_v1 = vld [vmem:[#allocation6 + $0x1c0] ss:$16 sps:$4 sm:$0xff]  }
  0x69   :  { %1680 = vmatpush1.bf16.msra.mxu0 %v4660_v30  ;;  %v4700_v0 = vld [vmem:[#allocation6 + $0x3c4] ss:$16 sps:$4 sm:$0xff]   ;;  %v4703_v2 = vld [vmem:[#allocation6 + $0x3c0] ss:$16 sps:$4 sm:$0xff]  }
  0x6a   :  { %1721 = vmatpush1.bf16.msra.mxu1 %v4661_v31  ;;  %1681 = vmatprep.subr.bf16.mxu0 %v4662_v32  ;;  %v4704_v3 = vld [vmem:[#allocation6 + $0x1e4] ss:$16 sps:$4 sm:$0xff]   ;;  %v4708_v5 = vld [vmem:[#allocation6 + $0x1e0] ss:$16 sps:$4 sm:$0xff]  }
  0x6b   :  { %1722 = vmatprep.subr.bf16.mxu1 %v4664_v33  ;;  %v4706_v4 = vld [vmem:[#allocation6 + $0x3e4] ss:$16 sps:$4 sm:$0xff]   ;;  %v4709_v6 = vld [vmem:[#allocation6 + $0x3e0] ss:$16 sps:$4 sm:$0xff]  }
  0x6c   :  { %v4712_v7 = vld [vmem:[#allocation6 + $0x404] ss:$16 sps:$4 sm:$0xff]   ;;  %v4710_v11 = vld [vmem:[#allocation6 + $0x400] ss:$16 sps:$4 sm:$0xff]  }
  0x6d   :  { %1682 = vmatpush1.bf16.msra.mxu0 %v4666_v34  ;;  %v4715_v8 = vld [vmem:[#allocation6 + $0x604] ss:$16 sps:$4 sm:$0xff]   ;;  %v4713_v12 = vld [vmem:[#allocation6 + $0x600] ss:$16 sps:$4 sm:$0xff]  }
  0x6e   :  { %1723 = vmatpush1.bf16.msra.mxu1 %v4667_v35  ;;  %1683 = vmatprep.subr.bf16.mxu0 %v4668_v36  ;;  %v4718_v13 = vld [vmem:[#allocation6 + $0x424] ss:$16 sps:$4 sm:$0xff]   ;;  %v4716_v15 = vld [vmem:[#allocation6 + $0x420] ss:$16 sps:$4 sm:$0xff]   ;;  %v92_v36 = vld [vmem:[#allocation3 + $0x18] sm:$0xff] }
  0x6f   :  { %1724 = vmatprep.subr.bf16.mxu1 %v4670_v37  ;;  %v4721_v14 = vld [vmem:[#allocation6 + $0x624] ss:$16 sps:$4 sm:$0xff]   ;;  %v4719_v16 = vld [vmem:[#allocation6 + $0x620] ss:$16 sps:$4 sm:$0xff]  }
  0x70   :  { %v4724_v17 = vld [vmem:[#allocation6 + $0x444] ss:$16 sps:$4 sm:$0xff]   ;;  %v4722_v19 = vld [vmem:[#allocation6 + $0x440] ss:$16 sps:$4 sm:$0xff]  }
  0x71   :  { %1684 = vmatpush1.bf16.msra.mxu0 %v4672_v38  ;;  %v4727_v18 = vld [vmem:[#allocation6 + $0x644] ss:$16 sps:$4 sm:$0xff]   ;;  %v4725_v20 = vld [vmem:[#allocation6 + $0x640] ss:$16 sps:$4 sm:$0xff]  }
  0x72   :  { %1725 = vmatpush1.bf16.msra.mxu1 %v4673_v39  ;;  %1685 = vmatprep.subr.bf16.mxu0 %v4674_v40  ;;  %v4730_v21 = vld [vmem:[#allocation6 + $0x464] ss:$16 sps:$4 sm:$0xff]   ;;  %v4728_v23 = vld [vmem:[#allocation6 + $0x460] ss:$16 sps:$4 sm:$0xff]   ;;  %v5570_v40 = vmax.bf16 %v5462_v47, %v92_v36  ;;  %v4827_v36 = vld [vmem:[#allocation6 + $0x268] ss:$16 sps:$4 sm:$0xff]  }
  0x73   :  { %1726 = vmatprep.subr.bf16.mxu1 %v4676_v41  ;;  %v4733_v22 = vld [vmem:[#allocation6 + $0x664] ss:$16 sps:$4 sm:$0xff]   ;;  %v4731_v24 = vld [vmem:[#allocation6 + $0x660] ss:$16 sps:$4 sm:$0xff]  }
  0x74   :  { %v4736_v25 = vld [vmem:[#allocation6 + $0x484] ss:$16 sps:$4 sm:$0xff]   ;;  %v4734_v27 = vld [vmem:[#allocation6 + $0x480] ss:$16 sps:$4 sm:$0xff]  }
  0x75   :  { %1686 = vmatpush1.bf16.msra.mxu0 %v4678_v42  ;;  %v4739_v26 = vld [vmem:[#allocation6 + $0x684] ss:$16 sps:$4 sm:$0xff]   ;;  %v4737_v28 = vld [vmem:[#allocation6 + $0x680] ss:$16 sps:$4 sm:$0xff]  }
  0x76   :  { %1727 = vmatpush1.bf16.msra.mxu1 %v4679_v43  ;;  %1687 = vmatprep.subr.bf16.mxu0 %v4680_v44  ;;  %v4742_v29 = vld [vmem:[#allocation6 + $0x4a4] ss:$16 sps:$4 sm:$0xff]   ;;  %v4740_v31 = vld [vmem:[#allocation6 + $0x4a0] ss:$16 sps:$4 sm:$0xff]   ;;  %v5578_v44 = vcombine.high %v5570_v40, %v5570_v40 }
  0x77   :  { %1728 = vmatprep.subr.bf16.mxu1 %v4682_v45  ;;  %v4745_v30 = vld [vmem:[#allocation6 + $0x6a4] ss:$16 sps:$4 sm:$0xff]   ;;  %v4743_v32 = vld [vmem:[#allocation6 + $0x6a0] ss:$16 sps:$4 sm:$0xff]  }
  0x78   :  { %v4748_v33 = vld [vmem:[#allocation6 + $0x4c4] ss:$16 sps:$4 sm:$0xff]   ;;  %v4746_v37 = vld [vmem:[#allocation6 + $0x4c0] ss:$16 sps:$4 sm:$0xff]  }
  0x79   :  { %1688 = vmatpush1.bf16.msra.mxu0 %v4684_v50  ;;  %v4751_v34 = vld [vmem:[#allocation6 + $0x6c4] ss:$16 sps:$4 sm:$0xff]   ;;  %v4749_v38 = vld [vmem:[#allocation6 + $0x6c0] ss:$16 sps:$4 sm:$0xff]  }
  0x7a   :  { %1729 = vmatpush1.bf16.msra.mxu1 %v4685_v51  ;;  %1689 = vmatprep.subr.bf16.mxu0 %v4686_v53  ;;  %v91_v35 = vld [vmem:[#allocation3 + $0x10] sm:$0xff] }
  0x7b   :  { %1730 = vmatprep.subr.bf16.mxu1 %v4688_v54  ;;  %v5567_v39 = vmax.bf16 %v5462_v47, %v91_v35  ;;  %v4754_v41 = vld [vmem:[#allocation6 + $0x4e4] ss:$16 sps:$4 sm:$0xff]   ;;  %v4752_v45 = vld [vmem:[#allocation6 + $0x4e0] ss:$16 sps:$4 sm:$0xff]   ;;  %v4824_v35 = vld [vmem:[#allocation6 + $0x68] ss:$16 sps:$4 sm:$0xff]  }
  0x7c   :  { %v4757_v42 = vld [vmem:[#allocation6 + $0x6e4] ss:$16 sps:$4 sm:$0xff]   ;;  %v4755_v46 = vld [vmem:[#allocation6 + $0x6e0] ss:$16 sps:$4 sm:$0xff]  }
  0x7d   :  { %1690 = vmatpush1.bf16.msra.mxu0 %v4690_v57  ;;  %v5574_v43 = vcombine.high %v5567_v39, %v5567_v39  ;;  %v4760_v47 = vld [vmem:[#allocation6 + $0x504] ss:$16 sps:$4 sm:$0xff]   ;;  %v4758_v49 = vld [vmem:[#allocation6 + $0x500] ss:$16 sps:$4 sm:$0xff]  }
  0x7e   :  { %1731 = vmatpush1.bf16.msra.mxu1 %v4691_v58  ;;  %1691 = vmatprep.subr.bf16.mxu0 %v4692_v59  ;;  %v4763_v48 = vld [vmem:[#allocation6 + $0x704] ss:$16 sps:$4 sm:$0xff]   ;;  %v4761_v50 = vld [vmem:[#allocation6 + $0x700] ss:$16 sps:$4 sm:$0xff]  }
  0x7f   :  { %1732 = vmatprep.subr.bf16.mxu1 %v4694_v60  ;;  %v4766_v51 = vld [vmem:[#allocation6 + $0x524] ss:$16 sps:$4 sm:$0xff]   ;;  %v4764_v53 = vld [vmem:[#allocation6 + $0x520] ss:$16 sps:$4 sm:$0xff]  }
  0x80   :  { %v4769_v52 = vld [vmem:[#allocation6 + $0x724] ss:$16 sps:$4 sm:$0xff]   ;;  %v4767_v54 = vld [vmem:[#allocation6 + $0x720] ss:$16 sps:$4 sm:$0xff]  }
  0x81   :  { %1692 = vmatpush1.bf16.msra.mxu0 %v4696_v61  ;;  %v4772_v57 = vld [vmem:[#allocation6 + $0x544] ss:$16 sps:$4 sm:$0xff]   ;;  %v4770_v59 = vld [vmem:[#allocation6 + $0x540] ss:$16 sps:$4 sm:$0xff]  }
  0x82   :  { %1733 = vmatpush1.bf16.msra.mxu1 %v4697_v62  ;;  %1693 = vmatprep.subr.bf16.mxu0 %v4698_v63  ;;  %v4775_v58 = vld [vmem:[#allocation6 + $0x744] ss:$16 sps:$4 sm:$0xff]   ;;  %v4773_v60 = vld [vmem:[#allocation6 + $0x740] ss:$16 sps:$4 sm:$0xff]  }
  0x83   :  { %1734 = vmatprep.subr.bf16.mxu1 %v4700_v0  ;;  %v4778_v61 = vld [vmem:[#allocation6 + $0x564] ss:$16 sps:$4 sm:$0xff]   ;;  %v4776_v63 = vld [vmem:[#allocation6 + $0x560] ss:$16 sps:$4 sm:$0xff]  }
  0x84   :  { %v4781_v62 = vld [vmem:[#allocation6 + $0x764] ss:$16 sps:$4 sm:$0xff]   ;;  %v4779_v0 = vld [vmem:[#allocation6 + $0x760] ss:$16 sps:$4 sm:$0xff]  }
  0x85   :  { %1694 = vmatpush1.bf16.msra.mxu0 %v4702_v1  ;;  %v4784_v1 = vld [vmem:[#allocation6 + $0x584] ss:$16 sps:$4 sm:$0xff]  }
  0x86   :  { %1735 = vmatpush1.bf16.msra.mxu1 %v4703_v2  ;;  %1695 = vmatprep.subr.bf16.mxu0 %v4704_v3  ;;  %v4787_v2 = vld [vmem:[#allocation6 + $0x784] ss:$16 sps:$4 sm:$0xff]   ;;  %v4782_v3 = vld [vmem:[#allocation6 + $0x580] ss:$16 sps:$4 sm:$0xff]  }
  0x87   :  { %1736 = vmatprep.subr.bf16.mxu1 %v4706_v4  ;;  %v4785_v4 = vld [vmem:[#allocation6 + $0x780] ss:$16 sps:$4 sm:$0xff]  }
  0x89   :  { %1696 = vmatpush1.bf16.msra.mxu0 %v4708_v5  ;;  %v4790_v5 = vld [vmem:[#allocation6 + $0x5a4] ss:$16 sps:$4 sm:$0xff]  }
  0x8a   :  { %1737 = vmatpush1.bf16.msra.mxu1 %v4709_v6  ;;  %1747 = vmatprep.subr.bf16.mxu0 %v4712_v7  ;;  %v4793_v6 = vld [vmem:[#allocation6 + $0x7a4] ss:$16 sps:$4 sm:$0xff]   ;;  %v4788_v7 = vld [vmem:[#allocation6 + $0x5a0] ss:$16 sps:$4 sm:$0xff]  }
  0x8b   :  { %1788 = vmatprep.subr.bf16.mxu1 %v4715_v8  ;;  %v4791_v8 = vld [vmem:[#allocation6 + $0x7a0] ss:$16 sps:$4 sm:$0xff]  }
  0x8c   :  { %1698 = vmatmul.mubr.bf16.vlgmr.msra.gmra.mrb[0].mxu0 %v5560_v9 }
  0x8d   :  { %1739 = vmatmul.mubr.bf16.vlgmr.msra.gmra.mrb[0].mxu1 %v5562_v10  ;;  %1748 = vmatpush1.bf16.msra.mxu0 %v4710_v11  ;;  %v4796_v11 = vld [vmem:[#allocation6 + $0x5c4] ss:$16 sps:$4 sm:$0xff]  }
  0x8e   :  { %1789 = vmatpush1.bf16.msra.mxu1 %v4713_v12  ;;  %1749 = vmatprep.subr.bf16.mxu0 %v4718_v13  ;;  %v4799_v12 = vld [vmem:[#allocation6 + $0x7c4] ss:$16 sps:$4 sm:$0xff]   ;;  %v4794_v13 = vld [vmem:[#allocation6 + $0x5c0] ss:$16 sps:$4 sm:$0xff]  }
  0x8f   :  { %1790 = vmatprep.subr.bf16.mxu1 %v4721_v14  ;;  %1779 = vmatprep.mubr.bf16.mxu0 %v5574_v43  ;;  %v4797_v14 = vld [vmem:[#allocation6 + $0x7c0] ss:$16 sps:$4 sm:$0xff]  }
  0x90   :  { %1820 = vmatprep.mubr.bf16.mxu1 %v5578_v44 }
  0x91   :  { %1750 = vmatpush1.bf16.msra.mxu0 %v4716_v15  ;;  %v4802_v15 = vld [vmem:[#allocation6 + $0x5e4] ss:$16 sps:$4 sm:$0xff]  }
  0x92   :  { %1791 = vmatpush1.bf16.msra.mxu1 %v4719_v16  ;;  %1751 = vmatprep.subr.bf16.mxu0 %v4724_v17  ;;  %v4805_v16 = vld [vmem:[#allocation6 + $0x7e4] ss:$16 sps:$4 sm:$0xff]   ;;  %v4800_v17 = vld [vmem:[#allocation6 + $0x5e0] ss:$16 sps:$4 sm:$0xff]  }
  0x93   :  { %1792 = vmatprep.subr.bf16.mxu1 %v4727_v18  ;;  %v4803_v18 = vld [vmem:[#allocation6 + $0x7e0] ss:$16 sps:$4 sm:$0xff]  }
  0x95   :  { %1752 = vmatpush1.bf16.msra.mxu0 %v4722_v19  ;;  %v4808_v19 = vld [vmem:[#allocation6 + $0xc] ss:$16 sps:$4 sm:$0xff]  }
  0x96   :  { %1793 = vmatpush1.bf16.msra.mxu1 %v4725_v20  ;;  %1753 = vmatprep.subr.bf16.mxu0 %v4730_v21  ;;  %v4811_v20 = vld [vmem:[#allocation6 + $0x20c] ss:$16 sps:$4 sm:$0xff]   ;;  %v5584_v21 = vcombine.low %v5567_v39, %v5567_v39  ;;  %v4830_v39 = vld [vmem:[#allocation6 + $0x88] ss:$16 sps:$4 sm:$0xff]  }
  0x97   :  { %1794 = vmatprep.subr.bf16.mxu1 %v4733_v22  ;;  %v5588_v22 = vcombine.low %v5570_v40, %v5570_v40  ;;  %v4841_v40 = vld [vmem:[#allocation6 + $0x2ac] ss:$16 sps:$4 sm:$0xff]  }
  0x99   :  { %1754 = vmatpush1.bf16.msra.mxu0 %v4728_v23  ;;  %v4806_v23 = vld [vmem:[#allocation6 + $0x8] ss:$16 sps:$4 sm:$0xff]  }
  0x9a   :  { %1795 = vmatpush1.bf16.msra.mxu1 %v4731_v24  ;;  %1755 = vmatprep.subr.bf16.mxu0 %v4736_v25  ;;  %v4809_v24 = vld [vmem:[#allocation6 + $0x208] ss:$16 sps:$4 sm:$0xff]   ;;  %v4814_v25 = vld [vmem:[#allocation6 + $0x2c] ss:$16 sps:$4 sm:$0xff]  }
  0x9b   :  { %1796 = vmatprep.subr.bf16.mxu1 %v4739_v26  ;;  %v4817_v26 = vld [vmem:[#allocation6 + $0x22c] ss:$16 sps:$4 sm:$0xff]  }
  0x9d   :  { %1756 = vmatpush1.bf16.msra.mxu0 %v4734_v27  ;;  %v4812_v27 = vld [vmem:[#allocation6 + $0x28] ss:$16 sps:$4 sm:$0xff]  }
  0x9e   :  { %1797 = vmatpush1.bf16.msra.mxu1 %v4737_v28  ;;  %1757 = vmatprep.subr.bf16.mxu0 %v4742_v29  ;;  %v4815_v28 = vld [vmem:[#allocation6 + $0x228] ss:$16 sps:$4 sm:$0xff]   ;;  %v4820_v29 = vld [vmem:[#allocation6 + $0x4c] ss:$16 sps:$4 sm:$0xff]  }
  0x9f   :  { %1798 = vmatprep.subr.bf16.mxu1 %v4745_v30  ;;  %v4823_v30 = vld [vmem:[#allocation6 + $0x24c] ss:$16 sps:$4 sm:$0xff]  }
  0xa1   :  { %1758 = vmatpush1.bf16.msra.mxu0 %v4740_v31  ;;  %v4818_v31 = vld [vmem:[#allocation6 + $0x48] ss:$16 sps:$4 sm:$0xff]  }
  0xa2   :  { %1799 = vmatpush1.bf16.msra.mxu1 %v4743_v32  ;;  %1759 = vmatprep.subr.bf16.mxu0 %v4748_v33  ;;  %v4821_v32 = vld [vmem:[#allocation6 + $0x248] ss:$16 sps:$4 sm:$0xff]   ;;  %v4826_v33 = vld [vmem:[#allocation6 + $0x6c] ss:$16 sps:$4 sm:$0xff]  }
  0xa3   :  { %1800 = vmatprep.subr.bf16.mxu1 %v4751_v34  ;;  %v4829_v34 = vld [vmem:[#allocation6 + $0x26c] ss:$16 sps:$4 sm:$0xff]  }
  0xa5   :  { %1760 = vmatpush1.bf16.msra.mxu0 %v4746_v37  ;;  %v4832_v37 = vld [vmem:[#allocation6 + $0x8c] ss:$16 sps:$4 sm:$0xff]  }
  0xa6   :  { %1801 = vmatpush1.bf16.msra.mxu1 %v4749_v38  ;;  %1761 = vmatprep.subr.bf16.mxu0 %v4754_v41  ;;  %v4835_v38 = vld [vmem:[#allocation6 + $0x28c] ss:$16 sps:$4 sm:$0xff]   ;;  %v4836_v41 = vld [vmem:[#allocation6 + $0xa8] ss:$16 sps:$4 sm:$0xff]  }
  0xa7   :  { %1802 = vmatprep.subr.bf16.mxu1 %v4757_v42  ;;  %v4839_v42 = vld [vmem:[#allocation6 + $0x2a8] ss:$16 sps:$4 sm:$0xff]  }
  0xa9   :  { %1762 = vmatpush1.bf16.msra.mxu0 %v4752_v45  ;;  %v4844_v45 = vld [vmem:[#allocation6 + $0xcc] ss:$16 sps:$4 sm:$0xff]  }
  0xaa   :  { %1803 = vmatpush1.bf16.msra.mxu1 %v4755_v46  ;;  %1763 = vmatprep.subr.bf16.mxu0 %v4760_v47  ;;  %v4847_v46 = vld [vmem:[#allocation6 + $0x2cc] ss:$16 sps:$4 sm:$0xff]   ;;  %v4842_v47 = vld [vmem:[#allocation6 + $0xc8] ss:$16 sps:$4 sm:$0xff]  }
  0xab   :  { %1804 = vmatprep.subr.bf16.mxu1 %v4763_v48  ;;  %v4845_v48 = vld [vmem:[#allocation6 + $0x2c8] ss:$16 sps:$4 sm:$0xff]  }
  0xad   :  { %1764 = vmatpush1.bf16.msra.mxu0 %v4758_v49  ;;  %v4850_v49 = vld [vmem:[#allocation6 + $0xec] ss:$16 sps:$4 sm:$0xff]  }
  0xae   :  { %1805 = vmatpush1.bf16.msra.mxu1 %v4761_v50  ;;  %1765 = vmatprep.subr.bf16.mxu0 %v4766_v51  ;;  %v4853_v50 = vld [vmem:[#allocation6 + $0x2ec] ss:$16 sps:$4 sm:$0xff]   ;;  %v4848_v51 = vld [vmem:[#allocation6 + $0xe8] ss:$16 sps:$4 sm:$0xff]  }
  0xaf   :  { %1806 = vmatprep.subr.bf16.mxu1 %v4769_v52  ;;  %v4851_v52 = vld [vmem:[#allocation6 + $0x2e8] ss:$16 sps:$4 sm:$0xff]  }
  0xb1   :  { %1766 = vmatpush1.bf16.msra.mxu0 %v4764_v53  ;;  %v4856_v53 = vld [vmem:[#allocation6 + $0x10c] ss:$16 sps:$4 sm:$0xff]  }
  0xb2   :  { %1807 = vmatpush1.bf16.msra.mxu1 %v4767_v54  ;;  %1767 = vmatprep.subr.bf16.mxu0 %v4772_v57  ;;  %v4859_v54 = vld [vmem:[#allocation6 + $0x30c] ss:$16 sps:$4 sm:$0xff]   ;;  %v4854_v57 = vld [vmem:[#allocation6 + $0x108] ss:$16 sps:$4 sm:$0xff]  }
  0xb3   :  { %1808 = vmatprep.subr.bf16.mxu1 %v4775_v58  ;;  %v4857_v58 = vld [vmem:[#allocation6 + $0x308] ss:$16 sps:$4 sm:$0xff]  }
  0xb5   :  { %1768 = vmatpush1.bf16.msra.mxu0 %v4770_v59  ;;  %v4862_v59 = vld [vmem:[#allocation6 + $0x12c] ss:$16 sps:$4 sm:$0xff]  }
  0xb6   :  { %1809 = vmatpush1.bf16.msra.mxu1 %v4773_v60  ;;  %1769 = vmatprep.subr.bf16.mxu0 %v4778_v61  ;;  %v4865_v60 = vld [vmem:[#allocation6 + $0x32c] ss:$16 sps:$4 sm:$0xff]   ;;  %v4860_v61 = vld [vmem:[#allocation6 + $0x128] ss:$16 sps:$4 sm:$0xff]  }
  0xb7   :  { %1810 = vmatprep.subr.bf16.mxu1 %v4781_v62  ;;  %v4863_v62 = vld [vmem:[#allocation6 + $0x328] ss:$16 sps:$4 sm:$0xff]  }
  0xb9   :  { %1770 = vmatpush1.bf16.msra.mxu0 %v4776_v63  ;;  %v4868_v63 = vld [vmem:[#allocation6 + $0x14c] ss:$16 sps:$4 sm:$0xff]  }
  0xba   :  { %1811 = vmatpush1.bf16.msra.mxu1 %v4779_v0  ;;  %1771 = vmatprep.subr.bf16.mxu0 %v4784_v1  ;;  %v4871_v0 = vld [vmem:[#allocation6 + $0x34c] ss:$16 sps:$4 sm:$0xff]   ;;  %v4866_v1 = vld [vmem:[#allocation6 + $0x148] ss:$16 sps:$4 sm:$0xff]  }
  0xbb   :  { %1812 = vmatprep.subr.bf16.mxu1 %v4787_v2  ;;  %v4869_v2 = vld [vmem:[#allocation6 + $0x348] ss:$16 sps:$4 sm:$0xff]  }
  0xbd   :  { %1772 = vmatpush1.bf16.msra.mxu0 %v4782_v3  ;;  %v4874_v3 = vld [vmem:[#allocation6 + $0x16c] ss:$16 sps:$4 sm:$0xff]  }
  0xbe   :  { %1813 = vmatpush1.bf16.msra.mxu1 %v4785_v4  ;;  %1773 = vmatprep.subr.bf16.mxu0 %v4790_v5  ;;  %v4877_v4 = vld [vmem:[#allocation6 + $0x36c] ss:$16 sps:$4 sm:$0xff]   ;;  %v4872_v5 = vld [vmem:[#allocation6 + $0x168] ss:$16 sps:$4 sm:$0xff]  }
  0xbf   :  { %1814 = vmatprep.subr.bf16.mxu1 %v4793_v6  ;;  %v4875_v6 = vld [vmem:[#allocation6 + $0x368] ss:$16 sps:$4 sm:$0xff]  }
  0xc1   :  { %1774 = vmatpush1.bf16.msra.mxu0 %v4788_v7  ;;  %v4880_v7 = vld [vmem:[#allocation6 + $0x18c] ss:$16 sps:$4 sm:$0xff]  }
  0xc2   :  { %1815 = vmatpush1.bf16.msra.mxu1 %v4791_v8  ;;  %1775 = vmatprep.subr.bf16.mxu0 %v4796_v11  ;;  %v4883_v8 = vld [vmem:[#allocation6 + $0x38c] ss:$16 sps:$4 sm:$0xff]   ;;  %v4878_v11 = vld [vmem:[#allocation6 + $0x188] ss:$16 sps:$4 sm:$0xff]  }
  0xc3   :  { %1816 = vmatprep.subr.bf16.mxu1 %v4799_v12  ;;  %v4881_v12 = vld [vmem:[#allocation6 + $0x388] ss:$16 sps:$4 sm:$0xff]  }
  0xc5   :  { %1776 = vmatpush1.bf16.msra.mxu0 %v4794_v13  ;;  %v4886_v13 = vld [vmem:[#allocation6 + $0x1ac] ss:$16 sps:$4 sm:$0xff]  }
  0xc6   :  { %1817 = vmatpush1.bf16.msra.mxu1 %v4797_v14  ;;  %1777 = vmatprep.subr.bf16.mxu0 %v4802_v15  ;;  %v4889_v14 = vld [vmem:[#allocation6 + $0x3ac] ss:$16 sps:$4 sm:$0xff]   ;;  %v4884_v15 = vld [vmem:[#allocation6 + $0x1a8] ss:$16 sps:$4 sm:$0xff]  }
  0xc7   :  { %1818 = vmatprep.subr.bf16.mxu1 %v4805_v16  ;;  %v4887_v16 = vld [vmem:[#allocation6 + $0x3a8] ss:$16 sps:$4 sm:$0xff]  }
  0xc9   :  { %1778 = vmatpush1.bf16.msra.mxu0 %v4800_v17  ;;  %v4892_v17 = vld [vmem:[#allocation6 + $0x1cc] ss:$16 sps:$4 sm:$0xff]  }
  0xca   :  { %1819 = vmatpush1.bf16.msra.mxu1 %v4803_v18  ;;  %1829 = vmatprep.subr.bf16.mxu0 %v4808_v19  ;;  %v4895_v18 = vld [vmem:[#allocation6 + $0x3cc] ss:$16 sps:$4 sm:$0xff]   ;;  %v4890_v19 = vld [vmem:[#allocation6 + $0x1c8] ss:$16 sps:$4 sm:$0xff]  }
  0xcb   :  { %1870 = vmatprep.subr.bf16.mxu1 %v4811_v20  ;;  %v4893_v20 = vld [vmem:[#allocation6 + $0x3c8] ss:$16 sps:$4 sm:$0xff]  }
  0xcc   :  { %1780 = vmatmul.mubr.bf16.vlgmr.msra.gmra.mrb[4].mxu0 %v5584_v21 }
  0xcd   :  { %1821 = vmatmul.mubr.bf16.vlgmr.msra.gmra.mrb[4].mxu1 %v5588_v22  ;;  %1830 = vmatpush1.bf16.msra.mxu0 %v4806_v23  ;;  %v4898_v23 = vld [vmem:[#allocation6 + $0x1ec] ss:$16 sps:$4 sm:$0xff]  }
  0xce   :  { %1871 = vmatpush1.bf16.msra.mxu1 %v4809_v24  ;;  %1831 = vmatprep.subr.bf16.mxu0 %v4814_v25  ;;  %v4901_v24 = vld [vmem:[#allocation6 + $0x3ec] ss:$16 sps:$4 sm:$0xff]   ;;  %v4896_v25 = vld [vmem:[#allocation6 + $0x1e8] ss:$16 sps:$4 sm:$0xff]  }
  0xcf   :  { %1872 = vmatprep.subr.bf16.mxu1 %v4817_v26  ;;  %1861 = vmatprep.mubr.bf16.mxu0 %v5554_v55  ;;  %v4833_v55 = vld [vmem:[#allocation6 + $0x288] ss:$16 sps:$4 sm:$0xff]  }
  0xd0   :  { %1902 = vmatprep.mubr.bf16.mxu1 %v5556_v56  ;;  %v4838_v56 = vld [vmem:[#allocation6 + $0xac] ss:$16 sps:$4 sm:$0xff]   ;;  %v4899_v26 = vld [vmem:[#allocation6 + $0x3e8] ss:$16 sps:$4 sm:$0xff]  }
  0xd1   :  { %1832 = vmatpush1.bf16.msra.mxu0 %v4812_v27  ;;  %v4904_v27 = vld [vmem:[#allocation6 + $0x40c] ss:$16 sps:$4 sm:$0xff]  }
  0xd2   :  { %1873 = vmatpush1.bf16.msra.mxu1 %v4815_v28  ;;  %1833 = vmatprep.subr.bf16.mxu0 %v4820_v29  ;;  %v4907_v28 = vld [vmem:[#allocation6 + $0x60c] ss:$16 sps:$4 sm:$0xff]   ;;  %v4902_v29 = vld [vmem:[#allocation6 + $0x408] ss:$16 sps:$4 sm:$0xff]  }
  0xd3   :  { %1874 = vmatprep.subr.bf16.mxu1 %v4823_v30  ;;  %v4905_v30 = vld [vmem:[#allocation6 + $0x608] ss:$16 sps:$4 sm:$0xff]  }
  0xd5   :  { %1834 = vmatpush1.bf16.msra.mxu0 %v4818_v31  ;;  %v4910_v31 = vld [vmem:[#allocation6 + $0x42c] ss:$16 sps:$4 sm:$0xff]  }
  0xd6   :  { %1875 = vmatpush1.bf16.msra.mxu1 %v4821_v32  ;;  %1835 = vmatprep.subr.bf16.mxu0 %v4826_v33  ;;  %v4913_v32 = vld [vmem:[#allocation6 + $0x62c] ss:$16 sps:$4 sm:$0xff]   ;;  %v4908_v33 = vld [vmem:[#allocation6 + $0x428] ss:$16 sps:$4 sm:$0xff]  }
  0xd7   :  { %1876 = vmatprep.subr.bf16.mxu1 %v4829_v34  ;;  %v4911_v34 = vld [vmem:[#allocation6 + $0x628] ss:$16 sps:$4 sm:$0xff]  }
  0xd9   :  { %1836 = vmatpush1.bf16.msra.mxu0 %v4824_v35  ;;  %v4916_v35 = vld [vmem:[#allocation6 + $0x44c] ss:$16 sps:$4 sm:$0xff]  }
  0xda   :  { %1877 = vmatpush1.bf16.msra.mxu1 %v4827_v36  ;;  %1837 = vmatprep.subr.bf16.mxu0 %v4832_v37  ;;  %v4919_v36 = vld [vmem:[#allocation6 + $0x64c] ss:$16 sps:$4 sm:$0xff]   ;;  %v4914_v37 = vld [vmem:[#allocation6 + $0x448] ss:$16 sps:$4 sm:$0xff]  }
  0xdb   :  { %1878 = vmatprep.subr.bf16.mxu1 %v4835_v38  ;;  %v4917_v38 = vld [vmem:[#allocation6 + $0x648] ss:$16 sps:$4 sm:$0xff]  }
  0xdd   :  { %1838 = vmatpush1.bf16.msra.mxu0 %v4830_v39  ;;  %v4922_v39 = vld [vmem:[#allocation6 + $0x46c] ss:$16 sps:$4 sm:$0xff]  }
  0xde   :  { %1879 = vmatpush1.bf16.msra.mxu1 %v4833_v55  ;;  %1839 = vmatprep.subr.bf16.mxu0 %v4838_v56  ;;  %v4923_v55 = vld [vmem:[#allocation6 + $0x668] ss:$16 sps:$4 sm:$0xff]   ;;  %v4928_v56 = vld [vmem:[#allocation6 + $0x48c] ss:$16 sps:$4 sm:$0xff]  }
  0xdf   :  { %1880 = vmatprep.subr.bf16.mxu1 %v4841_v40  ;;  %v4931_v40 = vld [vmem:[#allocation6 + $0x68c] ss:$16 sps:$4 sm:$0xff]  }
  0xe1   :  { %1840 = vmatpush1.bf16.msra.mxu0 %v4836_v41  ;;  %v4926_v41 = vld [vmem:[#allocation6 + $0x488] ss:$16 sps:$4 sm:$0xff]  }
  0xe2   :  { %1881 = vmatpush1.bf16.msra.mxu1 %v4839_v42  ;;  %1841 = vmatprep.subr.bf16.mxu0 %v4844_v45  ;;  %v4934_v42 = vld [vmem:[#allocation6 + $0x4ac] ss:$16 sps:$4 sm:$0xff]   ;;  %v4932_v45 = vld [vmem:[#allocation6 + $0x4a8] ss:$16 sps:$4 sm:$0xff]  }
  0xe3   :  { %1882 = vmatprep.subr.bf16.mxu1 %v4847_v46  ;;  %v4935_v46 = vld [vmem:[#allocation6 + $0x6a8] ss:$16 sps:$4 sm:$0xff]  }
  0xe5   :  { %1842 = vmatpush1.bf16.msra.mxu0 %v4842_v47  ;;  %v4940_v47 = vld [vmem:[#allocation6 + $0x4cc] ss:$16 sps:$4 sm:$0xff]  }
  0xe6   :  { %1883 = vmatpush1.bf16.msra.mxu1 %v4845_v48  ;;  %1843 = vmatprep.subr.bf16.mxu0 %v4850_v49  ;;  %v4943_v48 = vld [vmem:[#allocation6 + $0x6cc] ss:$16 sps:$4 sm:$0xff]   ;;  %v4938_v49 = vld [vmem:[#allocation6 + $0x4c8] ss:$16 sps:$4 sm:$0xff]  }
  0xe7   :  { %1884 = vmatprep.subr.bf16.mxu1 %v4853_v50  ;;  %v4941_v50 = vld [vmem:[#allocation6 + $0x6c8] ss:$16 sps:$4 sm:$0xff]  }
  0xe9   :  { %1844 = vmatpush1.bf16.msra.mxu0 %v4848_v51  ;;  %v4946_v51 = vld [vmem:[#allocation6 + $0x4ec] ss:$16 sps:$4 sm:$0xff]  }
  0xea   :  { %1885 = vmatpush1.bf16.msra.mxu1 %v4851_v52  ;;  %1845 = vmatprep.subr.bf16.mxu0 %v4856_v53  ;;  %v4949_v52 = vld [vmem:[#allocation6 + $0x6ec] ss:$16 sps:$4 sm:$0xff]   ;;  %v4944_v53 = vld [vmem:[#allocation6 + $0x4e8] ss:$16 sps:$4 sm:$0xff]  }
  0xeb   :  { %1886 = vmatprep.subr.bf16.mxu1 %v4859_v54  ;;  %v4947_v54 = vld [vmem:[#allocation6 + $0x6e8] ss:$16 sps:$4 sm:$0xff]  }
  0xed   :  { %1846 = vmatpush1.bf16.msra.mxu0 %v4854_v57  ;;  %v4952_v57 = vld [vmem:[#allocation6 + $0x50c] ss:$16 sps:$4 sm:$0xff]  }
  0xee   :  { %1887 = vmatpush1.bf16.msra.mxu1 %v4857_v58  ;;  %1847 = vmatprep.subr.bf16.mxu0 %v4862_v59  ;;  %v4955_v58 = vld [vmem:[#allocation6 + $0x70c] ss:$16 sps:$4 sm:$0xff]   ;;  %v4950_v59 = vld [vmem:[#allocation6 + $0x508] ss:$16 sps:$4 sm:$0xff]  }
  0xef   :  { %1888 = vmatprep.subr.bf16.mxu1 %v4865_v60  ;;  %v4953_v60 = vld [vmem:[#allocation6 + $0x708] ss:$16 sps:$4 sm:$0xff]  }
  0xf1   :  { %1848 = vmatpush1.bf16.msra.mxu0 %v4860_v61  ;;  %v4958_v61 = vld [vmem:[#allocation6 + $0x52c] ss:$16 sps:$4 sm:$0xff]  }
  0xf2   :  { %1889 = vmatpush1.bf16.msra.mxu1 %v4863_v62  ;;  %1849 = vmatprep.subr.bf16.mxu0 %v4868_v63  ;;  %v4961_v62 = vld [vmem:[#allocation6 + $0x72c] ss:$16 sps:$4 sm:$0xff]   ;;  %v4956_v63 = vld [vmem:[#allocation6 + $0x528] ss:$16 sps:$4 sm:$0xff]  }
  0xf3   :  { %1890 = vmatprep.subr.bf16.mxu1 %v4871_v0  ;;  %v4959_v0 = vld [vmem:[#allocation6 + $0x728] ss:$16 sps:$4 sm:$0xff]  }
  0xf5   :  { %1850 = vmatpush1.bf16.msra.mxu0 %v4866_v1  ;;  %v4964_v1 = vld [vmem:[#allocation6 + $0x54c] ss:$16 sps:$4 sm:$0xff]  }
  0xf6   :  { %1891 = vmatpush1.bf16.msra.mxu1 %v4869_v2  ;;  %1851 = vmatprep.subr.bf16.mxu0 %v4874_v3  ;;  %v4967_v2 = vld [vmem:[#allocation6 + $0x74c] ss:$16 sps:$4 sm:$0xff]   ;;  %v4962_v3 = vld [vmem:[#allocation6 + $0x548] ss:$16 sps:$4 sm:$0xff]  }
  0xf7   :  { %1892 = vmatprep.subr.bf16.mxu1 %v4877_v4  ;;  %v4965_v4 = vld [vmem:[#allocation6 + $0x748] ss:$16 sps:$4 sm:$0xff]  }
  0xf9   :  { %1852 = vmatpush1.bf16.msra.mxu0 %v4872_v5  ;;  %v4970_v5 = vld [vmem:[#allocation6 + $0x56c] ss:$16 sps:$4 sm:$0xff]  }
  0xfa   :  { %1893 = vmatpush1.bf16.msra.mxu1 %v4875_v6  ;;  %1853 = vmatprep.subr.bf16.mxu0 %v4880_v7  ;;  %v4973_v6 = vld [vmem:[#allocation6 + $0x76c] ss:$16 sps:$4 sm:$0xff]   ;;  %v4968_v7 = vld [vmem:[#allocation6 + $0x568] ss:$16 sps:$4 sm:$0xff]  }
  0xfb   :  { %1894 = vmatprep.subr.bf16.mxu1 %v4883_v8  ;;  %v4971_v8 = vld [vmem:[#allocation6 + $0x768] ss:$16 sps:$4 sm:$0xff]  }
  0xfd   :  { %1854 = vmatpush1.bf16.msra.mxu0 %v4878_v11  ;;  %v4976_v11 = vld [vmem:[#allocation6 + $0x58c] ss:$16 sps:$4 sm:$0xff]  }
  0xfe   :  { %1895 = vmatpush1.bf16.msra.mxu1 %v4881_v12  ;;  %1855 = vmatprep.subr.bf16.mxu0 %v4886_v13  ;;  %v4979_v12 = vld [vmem:[#allocation6 + $0x78c] ss:$16 sps:$4 sm:$0xff]   ;;  %v4974_v13 = vld [vmem:[#allocation6 + $0x588] ss:$16 sps:$4 sm:$0xff]  }
  0xff   :  { %1896 = vmatprep.subr.bf16.mxu1 %v4889_v14  ;;  %v4977_v14 = vld [vmem:[#allocation6 + $0x788] ss:$16 sps:$4 sm:$0xff]  }
 0x101   :  { %1856 = vmatpush1.bf16.msra.mxu0 %v4884_v15  ;;  %v4982_v15 = vld [vmem:[#allocation6 + $0x5ac] ss:$16 sps:$4 sm:$0xff]  }
 0x102   :  { %1897 = vmatpush1.bf16.msra.mxu1 %v4887_v16  ;;  %1857 = vmatprep.subr.bf16.mxu0 %v4892_v17  ;;  %v4985_v16 = vld [vmem:[#allocation6 + $0x7ac] ss:$16 sps:$4 sm:$0xff]   ;;  %v4980_v17 = vld [vmem:[#allocation6 + $0x5a8] ss:$16 sps:$4 sm:$0xff]  }
 0x103   :  { %1898 = vmatprep.subr.bf16.mxu1 %v4895_v18  ;;  %v4983_v18 = vld [vmem:[#allocation6 + $0x7a8] ss:$16 sps:$4 sm:$0xff]  }
 0x105   :  { %1858 = vmatpush1.bf16.msra.mxu0 %v4890_v19  ;;  %v4988_v19 = vld [vmem:[#allocation6 + $0x5cc] ss:$16 sps:$4 sm:$0xff]  }
 0x106   :  { %1899 = vmatpush1.bf16.msra.mxu1 %v4893_v20  ;;  %1859 = vmatprep.subr.bf16.mxu0 %v4898_v23  ;;  %v4991_v20 = vld [vmem:[#allocation6 + $0x7cc] ss:$16 sps:$4 sm:$0xff]   ;;  %v4986_v23 = vld [vmem:[#allocation6 + $0x5c8] ss:$16 sps:$4 sm:$0xff]  }
 0x107   :  { %1900 = vmatprep.subr.bf16.mxu1 %v4901_v24  ;;  %v4989_v24 = vld [vmem:[#allocation6 + $0x7c8] ss:$16 sps:$4 sm:$0xff]  }
 0x109   :  { %1860 = vmatpush1.bf16.msra.mxu0 %v4896_v25  ;;  %v4994_v25 = vld [vmem:[#allocation6 + $0x5ec] ss:$16 sps:$4 sm:$0xff]  }
 0x10a   :  { %1901 = vmatpush1.bf16.msra.mxu1 %v4899_v26  ;;  %1911 = vmatprep.subr.bf16.mxu0 %v4904_v27  ;;  %v4997_v26 = vld [vmem:[#allocation6 + $0x7ec] ss:$16 sps:$4 sm:$0xff]   ;;  %v4992_v27 = vld [vmem:[#allocation6 + $0x5e8] ss:$16 sps:$4 sm:$0xff]  }
 0x10b   :  { %1952 = vmatprep.subr.bf16.mxu1 %v4907_v28  ;;  %v4995_v28 = vld [vmem:[#allocation6 + $0x7e8] ss:$16 sps:$4 sm:$0xff]  }
 0x10c   :  { %1862 = vmatmul.mubr.bf16.vlgmr.msra.gmra.mrb[8].mxu0 %v5560_v9  ;;  %v4925_v9 = vld [vmem:[#allocation6 + $0x66c] ss:$16 sps:$4 sm:$0xff]  }
 0x10d   :  { %1903 = vmatmul.mubr.bf16.vlgmr.msra.gmra.mrb[8].mxu1 %v5562_v10  ;;  %1912 = vmatpush1.bf16.msra.mxu0 %v4902_v29  ;;  %v4920_v10 = vld [vmem:[#allocation6 + $0x468] ss:$16 sps:$4 sm:$0xff]   ;;  %v5000_v29 = vld [vmem:[#allocation8 + $0x4] ss:$24 sps:$4 sm:$0xff]  }
 0x10e   :  { %1953 = vmatpush1.bf16.msra.mxu1 %v4905_v30  ;;  %1913 = vmatprep.subr.bf16.mxu0 %v4910_v31  ;;  %v5003_v30 = vld [vmem:[#allocation8 + $0xc] ss:$24 sps:$4 sm:$0xff]   ;;  %v4998_v31 = vld [vmem:[#allocation8] ss:$24 sps:$4 sm:$0xff]  }
 0x10f   :  { %1954 = vmatprep.subr.bf16.mxu1 %v4913_v32  ;;  %1943 = vmatprep.mubr.bf16.mxu0 %v5574_v43  ;;  %v4929_v43 = vld [vmem:[#allocation6 + $0x688] ss:$16 sps:$4 sm:$0xff]  }
 0x110   :  { %1984 = vmatprep.mubr.bf16.mxu1 %v5578_v44  ;;  %v4937_v44 = vld [vmem:[#allocation6 + $0x6ac] ss:$16 sps:$4 sm:$0xff]   ;;  %v5001_v32 = vld [vmem:[#allocation8 + $0x8] ss:$24 sps:$4 sm:$0xff]  }
 0x111   :  { %1914 = vmatpush1.bf16.msra.mxu0 %v4908_v33  ;;  %v5006_v33 = vld [vmem:[#allocation8 + $0x34] ss:$24 sps:$4 sm:$0xff]  }
 0x112   :  { %1955 = vmatpush1.bf16.msra.mxu1 %v4911_v34  ;;  %1915 = vmatprep.subr.bf16.mxu0 %v4916_v35  ;;  %v5009_v34 = vld [vmem:[#allocation8 + $0x3c] ss:$24 sps:$4 sm:$0xff]   ;;  %v5004_v35 = vld [vmem:[#allocation8 + $0x30] ss:$24 sps:$4 sm:$0xff]  }
 0x113   :  { %1956 = vmatprep.subr.bf16.mxu1 %v4919_v36  ;;  %v5007_v36 = vld [vmem:[#allocation8 + $0x38] ss:$24 sps:$4 sm:$0xff]  }
 0x115   :  { %1916 = vmatpush1.bf16.msra.mxu0 %v4914_v37  ;;  %v5012_v37 = vld [vmem:[#allocation8 + $0x64] ss:$24 sps:$4 sm:$0xff]  }
 0x116   :  { %1957 = vmatpush1.bf16.msra.mxu1 %v4917_v38  ;;  %1917 = vmatprep.subr.bf16.mxu0 %v4922_v39  ;;  %v5015_v38 = vld [vmem:[#allocation8 + $0x6c] ss:$24 sps:$4 sm:$0xff]   ;;  %v5010_v39 = vld [vmem:[#allocation8 + $0x60] ss:$24 sps:$4 sm:$0xff]  }
 0x117   :  { %1958 = vmatprep.subr.bf16.mxu1 %v4925_v9  ;;  %v5013_v9 = vld [vmem:[#allocation8 + $0x68] ss:$24 sps:$4 sm:$0xff]  }
 0x119   :  { %1918 = vmatpush1.bf16.msra.mxu0 %v4920_v10  ;;  %v5018_v10 = vld [vmem:[#allocation8 + $0x94] ss:$24 sps:$4 sm:$0xff]  }
 0x11a   :  { %1959 = vmatpush1.bf16.msra.mxu1 %v4923_v55  ;;  %1919 = vmatprep.subr.bf16.mxu0 %v4928_v56  ;;  %v5021_v55 = vld [vmem:[#allocation8 + $0x9c] ss:$24 sps:$4 sm:$0xff]   ;;  %v5016_v56 = vld [vmem:[#allocation8 + $0x90] ss:$24 sps:$4 sm:$0xff]  }
 0x11b   :  { %1960 = vmatprep.subr.bf16.mxu1 %v4931_v40  ;;  %v5019_v40 = vld [vmem:[#allocation8 + $0x98] ss:$24 sps:$4 sm:$0xff]  }
 0x11d   :  { %1920 = vmatpush1.bf16.msra.mxu0 %v4926_v41  ;;  %v5024_v41 = vld [vmem:[#allocation8 + $0xc4] ss:$24 sps:$4 sm:$0xff]  }
 0x11e   :  { %1961 = vmatpush1.bf16.msra.mxu1 %v4929_v43  ;;  %1921 = vmatprep.subr.bf16.mxu0 %v4934_v42  ;;  %v5025_v43 = vld [vmem:[#allocation8 + $0xc8] ss:$24 sps:$4 sm:$0xff]   ;;  %v5030_v42 = vld [vmem:[#allocation8 + $0xf4] ss:$24 sps:$4 sm:$0xff]  }
 0x11f   :  { %1962 = vmatprep.subr.bf16.mxu1 %v4937_v44  ;;  %v5033_v44 = vld [vmem:[#allocation8 + $0xfc] ss:$24 sps:$4 sm:$0xff]  }
 0x121   :  { %1922 = vmatpush1.bf16.msra.mxu0 %v4932_v45  ;;  %v5028_v45 = vld [vmem:[#allocation8 + $0xf0] ss:$24 sps:$4 sm:$0xff]  }
 0x122   :  { %1963 = vmatpush1.bf16.msra.mxu1 %v4935_v46  ;;  %1923 = vmatprep.subr.bf16.mxu0 %v4940_v47  ;;  %v5031_v46 = vld [vmem:[#allocation8 + $0xf8] ss:$24 sps:$4 sm:$0xff]   ;;  %v5036_v47 = vld [vmem:[#allocation8 + $0x124] ss:$24 sps:$4 sm:$0xff]  }
 0x123   :  { %1964 = vmatprep.subr.bf16.mxu1 %v4943_v48  ;;  %v5039_v48 = vld [vmem:[#allocation8 + $0x12c] ss:$24 sps:$4 sm:$0xff]  }
 0x125   :  { %1924 = vmatpush1.bf16.msra.mxu0 %v4938_v49 }
 0x126   :  { %1965 = vmatpush1.bf16.msra.mxu1 %v4941_v50  ;;  %1925 = vmatprep.subr.bf16.mxu0 %v4946_v51  ;;  %v5034_v51 = vld [vmem:[#allocation8 + $0x120] ss:$24 sps:$4 sm:$0xff]  }
 0x127   :  { %1966 = vmatprep.subr.bf16.mxu1 %v4949_v52  ;;  %v5037_v52 = vld [vmem:[#allocation8 + $0x128] ss:$24 sps:$4 sm:$0xff]  }
 0x129   :  { %1926 = vmatpush1.bf16.msra.mxu0 %v4944_v53 }
 0x12a   :  { %1967 = vmatpush1.bf16.msra.mxu1 %v4947_v54  ;;  %1927 = vmatprep.subr.bf16.mxu0 %v4952_v57 }
 0x12b   :  { %1968 = vmatprep.subr.bf16.mxu1 %v4955_v58 }
 0x12d   :  { %1928 = vmatpush1.bf16.msra.mxu0 %v4950_v59 }
 0x12e   :  { %1969 = vmatpush1.bf16.msra.mxu1 %v4953_v60  ;;  %1929 = vmatprep.subr.bf16.mxu0 %v4958_v61 }
 0x12f   :  { %1970 = vmatprep.subr.bf16.mxu1 %v4961_v62 }
 0x131   :  { %1930 = vmatpush1.bf16.msra.mxu0 %v4956_v63  ;;  %v5042_v63 = vld [vmem:[#allocation8 + $0x154] ss:$24 sps:$4 sm:$0xff]  }
 0x132   :  { %1971 = vmatpush1.bf16.msra.mxu1 %v4959_v0  ;;  %1931 = vmatprep.subr.bf16.mxu0 %v4964_v1  ;;  %v5045_v0 = vld [vmem:[#allocation8 + $0x15c] ss:$24 sps:$4 sm:$0xff]   ;;  %v5040_v1 = vld [vmem:[#allocation8 + $0x150] ss:$24 sps:$4 sm:$0xff]  }
 0x133   :  { %1972 = vmatprep.subr.bf16.mxu1 %v4967_v2  ;;  %v5043_v2 = vld [vmem:[#allocation8 + $0x158] ss:$24 sps:$4 sm:$0xff]  }
 0x135   :  { %1932 = vmatpush1.bf16.msra.mxu0 %v4962_v3  ;;  %v5048_v3 = vld [vmem:[#allocation8 + $0x184] ss:$24 sps:$4 sm:$0xff]  }
 0x136   :  { %1973 = vmatpush1.bf16.msra.mxu1 %v4965_v4  ;;  %1933 = vmatprep.subr.bf16.mxu0 %v4970_v5  ;;  %v5051_v4 = vld [vmem:[#allocation8 + $0x18c] ss:$24 sps:$4 sm:$0xff]   ;;  %v5046_v5 = vld [vmem:[#allocation8 + $0x180] ss:$24 sps:$4 sm:$0xff]  }
 0x137   :  { %1974 = vmatprep.subr.bf16.mxu1 %v4973_v6  ;;  %v5049_v6 = vld [vmem:[#allocation8 + $0x188] ss:$24 sps:$4 sm:$0xff]  }
 0x139   :  { %1934 = vmatpush1.bf16.msra.mxu0 %v4968_v7  ;;  %v5054_v7 = vld [vmem:[#allocation8 + $0x1b4] ss:$24 sps:$4 sm:$0xff]  }
 0x13a   :  { %1975 = vmatpush1.bf16.msra.mxu1 %v4971_v8  ;;  %1935 = vmatprep.subr.bf16.mxu0 %v4976_v11  ;;  %v5057_v8 = vld [vmem:[#allocation8 + $0x1bc] ss:$24 sps:$4 sm:$0xff]   ;;  %v5052_v11 = vld [vmem:[#allocation8 + $0x1b0] ss:$24 sps:$4 sm:$0xff]  }
 0x13b   :  { %1976 = vmatprep.subr.bf16.mxu1 %v4979_v12  ;;  %v5055_v12 = vld [vmem:[#allocation8 + $0x1b8] ss:$24 sps:$4 sm:$0xff]  }
 0x13d   :  { %1936 = vmatpush1.bf16.msra.mxu0 %v4974_v13  ;;  %v5060_v13 = vld [vmem:[#allocation8 + $0x1e4] ss:$24 sps:$4 sm:$0xff]  }
 0x13e   :  { %1977 = vmatpush1.bf16.msra.mxu1 %v4977_v14  ;;  %1937 = vmatprep.subr.bf16.mxu0 %v4982_v15  ;;  %v5063_v14 = vld [vmem:[#allocation8 + $0x1ec] ss:$24 sps:$4 sm:$0xff]   ;;  %v5058_v15 = vld [vmem:[#allocation8 + $0x1e0] ss:$24 sps:$4 sm:$0xff]  }
 0x13f   :  { %1978 = vmatprep.subr.bf16.mxu1 %v4985_v16  ;;  %v5061_v16 = vld [vmem:[#allocation8 + $0x1e8] ss:$24 sps:$4 sm:$0xff]  }
 0x141   :  { %1938 = vmatpush1.bf16.msra.mxu0 %v4980_v17  ;;  %v5066_v17 = vld [vmem:[#allocation8 + $0x214] ss:$24 sps:$4 sm:$0xff]  }
 0x142   :  { %1979 = vmatpush1.bf16.msra.mxu1 %v4983_v18  ;;  %1939 = vmatprep.subr.bf16.mxu0 %v4988_v19  ;;  %v5069_v18 = vld [vmem:[#allocation8 + $0x21c] ss:$24 sps:$4 sm:$0xff]   ;;  %v5064_v19 = vld [vmem:[#allocation8 + $0x210] ss:$24 sps:$4 sm:$0xff]  }
 0x143   :  { %1980 = vmatprep.subr.bf16.mxu1 %v4991_v20  ;;  %v5067_v20 = vld [vmem:[#allocation8 + $0x218] ss:$24 sps:$4 sm:$0xff]  }
 0x145   :  { %1940 = vmatpush1.bf16.msra.mxu0 %v4986_v23  ;;  %v5072_v23 = vld [vmem:[#allocation8 + $0x244] ss:$24 sps:$4 sm:$0xff]  }
 0x146   :  { %1981 = vmatpush1.bf16.msra.mxu1 %v4989_v24  ;;  %1941 = vmatprep.subr.bf16.mxu0 %v4994_v25  ;;  %v5075_v24 = vld [vmem:[#allocation8 + $0x24c] ss:$24 sps:$4 sm:$0xff]   ;;  %v5070_v25 = vld [vmem:[#allocation8 + $0x240] ss:$24 sps:$4 sm:$0xff]  }
 0x147   :  { %1982 = vmatprep.subr.bf16.mxu1 %v4997_v26  ;;  %v5073_v26 = vld [vmem:[#allocation8 + $0x248] ss:$24 sps:$4 sm:$0xff]  }
 0x149   :  { %1942 = vmatpush1.bf16.msra.mxu0 %v4992_v27  ;;  %v5078_v27 = vld [vmem:[#allocation8 + $0x274] ss:$24 sps:$4 sm:$0xff]  }
 0x14a   :  { %1983 = vmatpush1.bf16.msra.mxu1 %v4995_v28  ;;  %3226 = vmatprep.subr.bf16.mxu0 %v5000_v29  ;;  %v5081_v28 = vld [vmem:[#allocation8 + $0x27c] ss:$24 sps:$4 sm:$0xff]   ;;  %v5076_v29 = vld [vmem:[#allocation8 + $0x270] ss:$24 sps:$4 sm:$0xff]  }
 0x14b   :  { %3308 = vmatprep.subr.bf16.mxu1 %v5003_v30  ;;  %v5079_v30 = vld [vmem:[#allocation8 + $0x278] ss:$24 sps:$4 sm:$0xff]  }
 0x14c   :  { %1944 = vmatmul.mubr.bf16.vlgmr.msra.gmra.mrb[12].mxu0 %v5584_v21  ;;  %v5027_v21 = vld [vmem:[#allocation8 + $0xcc] ss:$24 sps:$4 sm:$0xff]  }
 0x14d   :  { %1985 = vmatmul.mubr.bf16.vlgmr.msra.gmra.mrb[12].mxu1 %v5588_v22  ;;  %3227 = vmatpush1.bf16.msra.mxu0 %v4998_v31  ;;  %v5022_v22 = vld [vmem:[#allocation8 + $0xc0] ss:$24 sps:$4 sm:$0xff]   ;;  %v5084_v31 = vld [vmem:[#allocation8 + $0x2a4] ss:$24 sps:$4 sm:$0xff]  }
 0x14e   :  { %3309 = vmatpush1.bf16.msra.mxu1 %v5001_v32  ;;  %3228 = vmatprep.subr.bf16.mxu0 %v5006_v33  ;;  %v5087_v32 = vld [vmem:[#allocation8 + $0x2ac] ss:$24 sps:$4 sm:$0xff]   ;;  %v5082_v33 = vld [vmem:[#allocation8 + $0x2a0] ss:$24 sps:$4 sm:$0xff]  }
 0x14f   :  { %3310 = vmatprep.subr.bf16.mxu1 %v5009_v34  ;;  %v5085_v34 = vld [vmem:[#allocation8 + $0x2a8] ss:$24 sps:$4 sm:$0xff]  }
 0x151   :  { %3229 = vmatpush1.bf16.msra.mxu0 %v5004_v35  ;;  %v5090_v35 = vld [vmem:[#allocation8 + $0x2d4] ss:$24 sps:$4 sm:$0xff]  }
 0x152   :  { %3311 = vmatpush1.bf16.msra.mxu1 %v5007_v36  ;;  %3230 = vmatprep.subr.bf16.mxu0 %v5012_v37  ;;  %v5093_v36 = vld [vmem:[#allocation8 + $0x2dc] ss:$24 sps:$4 sm:$0xff]   ;;  %v5088_v37 = vld [vmem:[#allocation8 + $0x2d0] ss:$24 sps:$4 sm:$0xff]  }
 0x153   :  { %3312 = vmatprep.subr.bf16.mxu1 %v5015_v38  ;;  %v5091_v38 = vld [vmem:[#allocation8 + $0x2d8] ss:$24 sps:$4 sm:$0xff]  }
 0x155   :  { %3231 = vmatpush1.bf16.msra.mxu0 %v5010_v39  ;;  %v5096_v39 = vld [vmem:[#allocation8 + $0x304] ss:$24 sps:$4 sm:$0xff]  }
 0x156   :  { %3313 = vmatpush1.bf16.msra.mxu1 %v5013_v9  ;;  %3232 = vmatprep.subr.bf16.mxu0 %v5018_v10  ;;  %v5099_v9 = vld [vmem:[#allocation8 + $0x30c] ss:$24 sps:$4 sm:$0xff]   ;;  %v2010_v10 = vlaneseq }
 0x157   :  { %3314 = vmatprep.subr.bf16.mxu1 %v5021_v55 }
 0x158   :  { %v5604_v55 = vshrl.u32 %v2010_v10, 7  ;;  %v5159_v10 = vld [vmem:[#allocation8 + $0x4ec] ss:$24 sps:$4 sm:$0xff]  }
 0x159   :  { %3233 = vmatpush1.bf16.msra.mxu0 %v5016_v56 }
 0x15a   :  { %3315 = vmatpush1.bf16.msra.mxu1 %v5019_v40  ;;  %3234 = vmatprep.subr.bf16.mxu0 %v5024_v41  ;;  %v2012_v56 = vsub.s32 0, %v5604_v55  ;;  %v5610_v40 = vld [vmem:[%s5687_s2] sm:$0xf]  ;;  %v2016_v41 = vsub.s32 1, %v5604_v55 }
 0x15b   :  { %3316 = vmatprep.subr.bf16.mxu1 %v5027_v21 }
 0x15d   :  { %3235 = vmatpush1.bf16.msra.mxu0 %v5022_v22 }
 0x15e   :  { %3317 = vmatpush1.bf16.msra.mxu1 %v5025_v43  ;;  %3236 = vmatprep.subr.bf16.mxu0 %v5030_v42  ;;  %v2013_v42 = vrot.slane %v5610_v40, %v2012_v56 }
 0x15f   :  { %3318 = vmatprep.subr.bf16.mxu1 %v5033_v44  ;;  %v1699_v49 = vpop.f32.mrb[0].mxu0 }
 0x160   :  { %v1740_v50 = vpop.f32.mrb[0].mxu1  ;;  %v1701_v54 = vpop.f32.mrb[1].mxu0 }
 0x161   :  { %v5600_v53 = vadd.f32 %v1740_v50, %v1699_v49  ;;  %v1742_v57 = vpop.f32.mrb[1].mxu1  ;;  %v1703_v59 = vpop.f32.mrb[2].mxu0  ;;  %3237 = vmatpush1.bf16.msra.mxu0 %v5028_v45 }
 0x162   :  { %v5602_v58 = vadd.f32 %v1742_v57, %v1701_v54  ;;  %v1744_v60 = vpop.f32.mrb[2].mxu1  ;;  %3319 = vmatpush1.bf16.msra.mxu1 %v5031_v46  ;;  %v1704_v61 = vpop.f32.mrb[3].mxu0  ;;  %3238 = vmatprep.subr.bf16.mxu0 %v5036_v47  ;;  %v2017_v47 = vrot.slane %v5610_v40, %v2016_v41 }
 0x163   :  { %v1745_v62 = vpop.f32.mrb[3].mxu1  ;;  %3320 = vmatprep.subr.bf16.mxu1 %v5039_v48 }
 0x164   :  { %v5094_v62 = vld [vmem:[#allocation8 + $0x300] ss:$24 sps:$4 sm:$0xff]  }
 0x165   :  { %3239 = vmatpush1.bf16.msra.mxu0 %v5034_v51 }
 0x166   :  { %3321 = vmatpush1.bf16.msra.mxu1 %v5037_v52  ;;  %3240 = vmatprep.subr.bf16.mxu0 %v5042_v63  ;;  %v5097_v63 = vld [vmem:[#allocation8 + $0x308] ss:$24 sps:$4 sm:$0xff]  }
 0x167   :  { %3322 = vmatprep.subr.bf16.mxu1 %v5045_v0 }
 0x169   :  { %3241 = vmatpush1.bf16.msra.mxu0 %v5040_v1  ;;  %v5105_v1 = vld [vmem:[#allocation8 + $0x33c] ss:$24 sps:$4 sm:$0xff]  }
 0x16a   :  { %3323 = vmatpush1.bf16.msra.mxu1 %v5043_v2  ;;  %3242 = vmatprep.subr.bf16.mxu0 %v5048_v3  ;;  %v5100_v2 = vld [vmem:[#allocation8 + $0x330] ss:$24 sps:$4 sm:$0xff]  }
 0x16b   :  { %3324 = vmatprep.subr.bf16.mxu1 %v5051_v4  ;;  %v5103_v3 = vld [vmem:[#allocation8 + $0x338] ss:$24 sps:$4 sm:$0xff]   ;;  %v5108_v4 = vld [vmem:[#allocation8 + $0x364] ss:$24 sps:$4 sm:$0xff]  }
 0x16d   :  { %3243 = vmatpush1.bf16.msra.mxu0 %v5046_v5  ;;  %v5111_v5 = vld [vmem:[#allocation8 + $0x36c] ss:$24 sps:$4 sm:$0xff]  }
 0x16e   :  { %3325 = vmatpush1.bf16.msra.mxu1 %v5049_v6  ;;  %3244 = vmatprep.subr.bf16.mxu0 %v5054_v7  ;;  %v5106_v6 = vld [vmem:[#allocation8 + $0x360] ss:$24 sps:$4 sm:$0xff]  }
 0x16f   :  { %3326 = vmatprep.subr.bf16.mxu1 %v5057_v8  ;;  %v5109_v7 = vld [vmem:[#allocation8 + $0x368] ss:$24 sps:$4 sm:$0xff]   ;;  %v5114_v8 = vld [vmem:[#allocation8 + $0x394] ss:$24 sps:$4 sm:$0xff]  }
 0x171   :  { %3245 = vmatpush1.bf16.msra.mxu0 %v5052_v11  ;;  %v5117_v11 = vld [vmem:[#allocation8 + $0x39c] ss:$24 sps:$4 sm:$0xff]  }
 0x172   :  { %3327 = vmatpush1.bf16.msra.mxu1 %v5055_v12  ;;  %3246 = vmatprep.subr.bf16.mxu0 %v5060_v13  ;;  %v5112_v12 = vld [vmem:[#allocation8 + $0x390] ss:$24 sps:$4 sm:$0xff]  }
 0x173   :  { %3328 = vmatprep.subr.bf16.mxu1 %v5063_v14  ;;  %v5115_v13 = vld [vmem:[#allocation8 + $0x398] ss:$24 sps:$4 sm:$0xff]   ;;  %v5120_v14 = vld [vmem:[#allocation8 + $0x3c4] ss:$24 sps:$4 sm:$0xff]  }
 0x175   :  { %3247 = vmatpush1.bf16.msra.mxu0 %v5058_v15  ;;  %v5123_v15 = vld [vmem:[#allocation8 + $0x3cc] ss:$24 sps:$4 sm:$0xff]  }
 0x176   :  { %3329 = vmatpush1.bf16.msra.mxu1 %v5061_v16  ;;  %3248 = vmatprep.subr.bf16.mxu0 %v5066_v17  ;;  %v5118_v16 = vld [vmem:[#allocation8 + $0x3c0] ss:$24 sps:$4 sm:$0xff]  }
 0x177   :  { %3330 = vmatprep.subr.bf16.mxu1 %v5069_v18  ;;  %v5121_v17 = vld [vmem:[#allocation8 + $0x3c8] ss:$24 sps:$4 sm:$0xff]   ;;  %v5126_v18 = vld [vmem:[#allocation8 + $0x3f4] ss:$24 sps:$4 sm:$0xff]  }
 0x179   :  { %3249 = vmatpush1.bf16.msra.mxu0 %v5064_v19  ;;  %v5129_v19 = vld [vmem:[#allocation8 + $0x3fc] ss:$24 sps:$4 sm:$0xff]  }
 0x17a   :  { %3331 = vmatpush1.bf16.msra.mxu1 %v5067_v20  ;;  %3250 = vmatprep.subr.bf16.mxu0 %v5072_v23  ;;  %v5124_v20 = vld [vmem:[#allocation8 + $0x3f0] ss:$24 sps:$4 sm:$0xff]  }
 0x17b   :  { %3332 = vmatprep.subr.bf16.mxu1 %v5075_v24  ;;  %v5127_v23 = vld [vmem:[#allocation8 + $0x3f8] ss:$24 sps:$4 sm:$0xff]   ;;  %v5132_v24 = vld [vmem:[#allocation8 + $0x424] ss:$24 sps:$4 sm:$0xff]  }
 0x17d   :  { %3251 = vmatpush1.bf16.msra.mxu0 %v5070_v25  ;;  %v5135_v25 = vld [vmem:[#allocation8 + $0x42c] ss:$24 sps:$4 sm:$0xff]  }
 0x17e   :  { %3333 = vmatpush1.bf16.msra.mxu1 %v5073_v26  ;;  %3252 = vmatprep.subr.bf16.mxu0 %v5078_v27  ;;  %v5130_v26 = vld [vmem:[#allocation8 + $0x420] ss:$24 sps:$4 sm:$0xff]  }
 0x17f   :  { %3334 = vmatprep.subr.bf16.mxu1 %v5081_v28  ;;  %v5133_v27 = vld [vmem:[#allocation8 + $0x428] ss:$24 sps:$4 sm:$0xff]   ;;  %v5138_v28 = vld [vmem:[#allocation8 + $0x454] ss:$24 sps:$4 sm:$0xff]  }
 0x181   :  { %3253 = vmatpush1.bf16.msra.mxu0 %v5076_v29  ;;  %v5141_v29 = vld [vmem:[#allocation8 + $0x45c] ss:$24 sps:$4 sm:$0xff]  }
 0x182   :  { %3335 = vmatpush1.bf16.msra.mxu1 %v5079_v30  ;;  %3254 = vmatprep.subr.bf16.mxu0 %v5084_v31  ;;  %v5136_v30 = vld [vmem:[#allocation8 + $0x450] ss:$24 sps:$4 sm:$0xff]  }
 0x183   :  { %3336 = vmatprep.subr.bf16.mxu1 %v5087_v32  ;;  %v5139_v31 = vld [vmem:[#allocation8 + $0x458] ss:$24 sps:$4 sm:$0xff]   ;;  %v5144_v32 = vld [vmem:[#allocation8 + $0x484] ss:$24 sps:$4 sm:$0xff]  }
 0x185   :  { %3255 = vmatpush1.bf16.msra.mxu0 %v5082_v33  ;;  %v5147_v33 = vld [vmem:[#allocation8 + $0x48c] ss:$24 sps:$4 sm:$0xff]  }
 0x186   :  { %3337 = vmatpush1.bf16.msra.mxu1 %v5085_v34  ;;  %3256 = vmatprep.subr.bf16.mxu0 %v5090_v35  ;;  %v5142_v34 = vld [vmem:[#allocation8 + $0x480] ss:$24 sps:$4 sm:$0xff]  }
 0x187   :  { %3338 = vmatprep.subr.bf16.mxu1 %v5093_v36  ;;  %v5145_v35 = vld [vmem:[#allocation8 + $0x488] ss:$24 sps:$4 sm:$0xff]   ;;  %v5150_v36 = vld [vmem:[#allocation8 + $0x4b4] ss:$24 sps:$4 sm:$0xff]  }
 0x189   :  { %3257 = vmatpush1.bf16.msra.mxu0 %v5088_v37  ;;  %v5153_v37 = vld [vmem:[#allocation8 + $0x4bc] ss:$24 sps:$4 sm:$0xff]  }
 0x18a   :  { %3339 = vmatpush1.bf16.msra.mxu1 %v5091_v38  ;;  %3267 = vmatprep.subr.bf16.mxu0 %v5096_v39  ;;  %v5148_v38 = vld [vmem:[#allocation8 + $0x4b0] ss:$24 sps:$4 sm:$0xff]  }
 0x18b   :  { %3349 = vmatprep.subr.bf16.mxu1 %v5099_v9  ;;  %v5151_v39 = vld [vmem:[#allocation8 + $0x4b8] ss:$24 sps:$4 sm:$0xff]   ;;  %v5156_v9 = vld [vmem:[#allocation8 + $0x4e4] ss:$24 sps:$4 sm:$0xff]  }
 0x19f   :  { %v1781_v21 = vpop.f32.mrb[4].mxu0 }
 0x1a0   :  { %v1822_v22 = vpop.f32.mrb[4].mxu1  ;;  %v1782_v43 = vadd.f32 %v1781_v21, %v5600_v53  ;;  %v1783_v44 = vpop.f32.mrb[5].mxu0  ;;  %v5154_v21 = vld [vmem:[#allocation8 + $0x4e0] ss:$24 sps:$4 sm:$0xff]  }
 0x1a1   :  { %v1824_v45 = vpop.f32.mrb[5].mxu1  ;;  %v1784_v46 = vadd.f32 %v1783_v44, %v5602_v58  ;;  %v1785_v48 = vpop.f32.mrb[6].mxu0  ;;  %v5102_v58 = vld [vmem:[#allocation8 + $0x334] ss:$24 sps:$4 sm:$0xff]   ;;  %v5160_v44 = vld [vmem:[#allocation8 + $0x510] ss:$24 sps:$4 sm:$0xff]  }
 0x1a2   :  { %v1826_v49 = vpop.f32.mrb[6].mxu1  ;;  %v1823_v50 = vadd.f32 %v1822_v22, %v1782_v43  ;;  %v1786_v51 = vpop.f32.mrb[7].mxu0  ;;  %v5157_v22 = vld [vmem:[#allocation8 + $0x4e8] ss:$24 sps:$4 sm:$0xff]   ;;  %v5162_v43 = vld [vmem:[#allocation8 + $0x514] ss:$24 sps:$4 sm:$0xff]  }
 0x1a3   :  { %v1827_v52 = vpop.f32.mrb[7].mxu1  ;;  %v1825_v54 = vadd.f32 %v1824_v45, %v1784_v46  ;;  %v5163_v45 = vld [vmem:[#allocation8 + $0x518] ss:$24 sps:$4 sm:$0xff]   ;;  %v5168_v46 = vld [vmem:[#allocation8 + $0x544] ss:$24 sps:$4 sm:$0xff]  }
 0x1a4   :  { %v2030_v57 = vadd.f32 %v2013_v42, %v1823_v50  ;;  %v5165_v42 = vld [vmem:[#allocation8 + $0x51c] ss:$24 sps:$4 sm:$0xff]   ;;  %v5166_v48 = vld [vmem:[#allocation8 + $0x540] ss:$24 sps:$4 sm:$0xff]   ;;  %v5172_v52 = vld [vmem:[#allocation8 + $0x570] ss:$24 sps:$4 sm:$0xff]  }
 0x1a5   :  { %v2031_v53 = vadd.f32 %v2017_v47, %v1825_v54  ;;  %v5171_v47 = vld [vmem:[#allocation8 + $0x54c] ss:$24 sps:$4 sm:$0xff]   ;;  %v5169_v49 = vld [vmem:[#allocation8 + $0x548] ss:$24 sps:$4 sm:$0xff]   ;;  %v5177_v51 = vld [vmem:[#allocation8 + $0x57c] ss:$24 sps:$4 sm:$0xff]  }
 0x1a6   :  { %v2034_v59 = vmax.f32 %v2030_v57, 0.0  ;;  %v5174_v50 = vld [vmem:[#allocation8 + $0x574] ss:$24 sps:$4 sm:$0xff]   ;;  %v5175_v54 = vld [vmem:[#allocation8 + $0x578] ss:$24 sps:$4 sm:$0xff]  }
 0x1a7   :  { %v2035_v60 = vmax.f32 %v2031_v53, 0.0  ;;  %v5180_v57 = vld [vmem:[#allocation8 + $0x5a4] ss:$24 sps:$4 sm:$0xff]  }
 0x1a8   :  { %v5623_v0 = vpack.c.bf16 %v2034_v59, %v2034_v59  ;;  %v5183_v53 = vld [vmem:[#allocation8 + $0x5ac] ss:$24 sps:$4 sm:$0xff]  }
 0x1a9   :  { %v5621_v61 = vpack.c.bf16 %v2035_v60, %v2035_v60 }
 0x1ab   :  { %3258 = vmatprep.mubr.bf16.mxu0 %v5621_v61  ;;  %3340 = vmatprep.mubr.bf16.mxu1 %v5621_v61 }
 0x1ac   :  { %3259 = vmatmul.mubr.bf16.vlgmr.msra.gmra.mrb[16].mxu0 %v5623_v0  ;;  %3341 = vmatmul.mubr.bf16.vlgmr.msra.gmra.mrb[16].mxu1 %v5623_v0 }
 0x1ad   :  { %3268 = vmatpush1.bf16.msra.mxu0 %v5094_v62  ;;  %3350 = vmatpush1.bf16.msra.mxu1 %v5097_v63 }
 0x1ae   :  { %3269 = vmatprep.subr.bf16.mxu0 %v5102_v58  ;;  %3351 = vmatprep.subr.bf16.mxu1 %v5105_v1 }
 0x1b1   :  { %3270 = vmatpush1.bf16.msra.mxu0 %v5100_v2  ;;  %3352 = vmatpush1.bf16.msra.mxu1 %v5103_v3 }
 0x1b2   :  { %3271 = vmatprep.subr.bf16.mxu0 %v5108_v4  ;;  %3353 = vmatprep.subr.bf16.mxu1 %v5111_v5  ;;  %v5178_v4 = vld [vmem:[#allocation8 + $0x5a0] ss:$24 sps:$4 sm:$0xff]  }
 0x1b3   :  { %v5181_v5 = vld [vmem:[#allocation8 + $0x5a8] ss:$24 sps:$4 sm:$0xff]  }
 0x1b5   :  { %3272 = vmatpush1.bf16.msra.mxu0 %v5106_v6  ;;  %3354 = vmatpush1.bf16.msra.mxu1 %v5109_v7 }
 0x1b6   :  { %3273 = vmatprep.subr.bf16.mxu0 %v5114_v8  ;;  %3355 = vmatprep.subr.bf16.mxu1 %v5117_v11  ;;  %v5186_v8 = vld [vmem:[#allocation8 + $0x5d4] ss:$24 sps:$4 sm:$0xff]  }
 0x1b7   :  { %v5189_v11 = vld [vmem:[#allocation8 + $0x5dc] ss:$24 sps:$4 sm:$0xff]  }
 0x1b9   :  { %3274 = vmatpush1.bf16.msra.mxu0 %v5112_v12  ;;  %3356 = vmatpush1.bf16.msra.mxu1 %v5115_v13  ;;  %v5184_v12 = vld [vmem:[#allocation8 + $0x5d0] ss:$24 sps:$4 sm:$0xff]  }
 0x1ba   :  { %3275 = vmatprep.subr.bf16.mxu0 %v5120_v14  ;;  %3357 = vmatprep.subr.bf16.mxu1 %v5123_v15  ;;  %v5187_v13 = vld [vmem:[#allocation8 + $0x5d8] ss:$24 sps:$4 sm:$0xff]   ;;  %v5192_v14 = vld [vmem:[#allocation8 + $0x14] ss:$24 sps:$4 sm:$0xff]   ;;  %v2020_v15 = vsub.s32 2, %v5604_v55 }
 0x1bd   :  { %3276 = vmatpush1.bf16.msra.mxu0 %v5118_v16  ;;  %3358 = vmatpush1.bf16.msra.mxu1 %v5121_v17  ;;  %v2024_v16 = vsub.s32 3, %v5604_v55 }
 0x1be   :  { %3277 = vmatprep.subr.bf16.mxu0 %v5126_v18  ;;  %3359 = vmatprep.subr.bf16.mxu1 %v5129_v19 }
 0x1c1   :  { %3278 = vmatpush1.bf16.msra.mxu0 %v5124_v20  ;;  %3360 = vmatpush1.bf16.msra.mxu1 %v5127_v23  ;;  %v2021_v20 = vrot.slane %v5610_v40, %v2020_v15 }
 0x1c2   :  { %3279 = vmatprep.subr.bf16.mxu0 %v5132_v24  ;;  %3361 = vmatprep.subr.bf16.mxu1 %v5135_v25 }
 0x1c5   :  { %3280 = vmatpush1.bf16.msra.mxu0 %v5130_v26  ;;  %3362 = vmatpush1.bf16.msra.mxu1 %v5133_v27  ;;  %v2025_v26 = vrot.slane %v5610_v40, %v2024_v16  ;;  %v5286_v40 = vld [vmem:[#allocation9 + $0x40] sm:$0xff]  }
 0x1c6   :  { %3281 = vmatprep.subr.bf16.mxu0 %v5138_v28  ;;  %3363 = vmatprep.subr.bf16.mxu1 %v5141_v29 }
 0x1c9   :  { %3282 = vmatpush1.bf16.msra.mxu0 %v5136_v30  ;;  %3364 = vmatpush1.bf16.msra.mxu1 %v5139_v31 }
 0x1ca   :  { %3283 = vmatprep.subr.bf16.mxu0 %v5144_v32  ;;  %3365 = vmatprep.subr.bf16.mxu1 %v5147_v33 }
 0x1cd   :  { %3284 = vmatpush1.bf16.msra.mxu0 %v5142_v34  ;;  %3366 = vmatpush1.bf16.msra.mxu1 %v5145_v35 }
 0x1ce   :  { %3285 = vmatprep.subr.bf16.mxu0 %v5150_v36  ;;  %3367 = vmatprep.subr.bf16.mxu1 %v5153_v37 }
 0x1d1   :  { %3286 = vmatpush1.bf16.msra.mxu0 %v5148_v38  ;;  %3368 = vmatpush1.bf16.msra.mxu1 %v5151_v39  ;;  %v5190_v38 = vld [vmem:[#allocation8 + $0x10] ss:$24 sps:$4 sm:$0xff]  }
 0x1d2   :  { %3287 = vmatprep.subr.bf16.mxu0 %v5156_v9  ;;  %3369 = vmatprep.subr.bf16.mxu1 %v5159_v10  ;;  %v5195_v9 = vld [vmem:[#allocation8 + $0x44] ss:$24 sps:$4 sm:$0xff]  }
 0x1d3   :  { %v5287_v10 = vld [vmem:[#allocation9] sm:$0xff]  }
 0x1d5   :  { %3288 = vmatpush1.bf16.msra.mxu0 %v5154_v21  ;;  %3370 = vmatpush1.bf16.msra.mxu1 %v5157_v22  ;;  %v5288_v21 = vld [vmem:[#allocation9 + $0x48] sm:$0xff]   ;;  %v5193_v22 = vld [vmem:[#allocation8 + $0x40] ss:$24 sps:$4 sm:$0xff]  }
 0x1d6   :  { %3289 = vmatprep.subr.bf16.mxu0 %v5162_v43  ;;  %3371 = vmatprep.subr.bf16.mxu1 %v5165_v42  ;;  %v5198_v43 = vld [vmem:[#allocation8 + $0x74] ss:$24 sps:$4 sm:$0xff]  }
 0x1d7   :  { %v5289_v42 = vld [vmem:[#allocation9 + $0x8] sm:$0xff]  }
 0x1d9   :  { %3290 = vmatpush1.bf16.msra.mxu0 %v5160_v44  ;;  %3372 = vmatpush1.bf16.msra.mxu1 %v5163_v45  ;;  %v5290_v44 = vld [vmem:[#allocation9 + $0x50] sm:$0xff]  }
 0x1da   :  { %3291 = vmatprep.subr.bf16.mxu0 %v5168_v46  ;;  %3373 = vmatprep.subr.bf16.mxu1 %v5171_v47  ;;  %v5196_v45 = vld [vmem:[#allocation8 + $0x70] ss:$24 sps:$4 sm:$0xff]   ;;  %v5201_v46 = vld [vmem:[#allocation8 + $0xa4] ss:$24 sps:$4 sm:$0xff]  }
 0x1db   :  { %v5291_v47 = vld [vmem:[#allocation9 + $0x10] sm:$0xff]  }
 0x1dd   :  { %3292 = vmatpush1.bf16.msra.mxu0 %v5166_v48  ;;  %3374 = vmatpush1.bf16.msra.mxu1 %v5169_v49  ;;  %v5292_v48 = vld [vmem:[#allocation9 + $0x58] sm:$0xff]  }
 0x1de   :  { %3293 = vmatprep.subr.bf16.mxu0 %v5174_v50  ;;  %3375 = vmatprep.subr.bf16.mxu1 %v5177_v51  ;;  %v5199_v49 = vld [vmem:[#allocation8 + $0xa0] ss:$24 sps:$4 sm:$0xff]  }
 0x1df   :  { %v1863_v59 = vpop.f32.mrb[8].mxu0  ;;  %v5293_v50 = vld [vmem:[#allocation9 + $0x18] sm:$0xff]   ;;  %v5294_v51 = vld [vmem:[#allocation9 + $0x60] sm:$0xff]  }
 0x1e0   :  { %v1904_v60 = vpop.f32.mrb[8].mxu1  ;;  %v1865_v63 = vpop.f32.mrb[9].mxu0 }
 0x1e1   :  { %v1905_v62 = vadd.f32 %v1904_v60, %v1863_v59  ;;  %v1906_v58 = vpop.f32.mrb[9].mxu1  ;;  %v1867_v2 = vpop.f32.mrb[10].mxu0  ;;  %3294 = vmatpush1.bf16.msra.mxu0 %v5172_v52  ;;  %3376 = vmatpush1.bf16.msra.mxu1 %v5175_v54  ;;  %v5202_v52 = vld [vmem:[#allocation8 + $0xd0] ss:$24 sps:$4 sm:$0xff]   ;;  %v5207_v54 = vld [vmem:[#allocation8 + $0x104] ss:$24 sps:$4 sm:$0xff]  }
 0x1e2   :  { %v1907_v1 = vadd.f32 %v1906_v58, %v1865_v63  ;;  %v1908_v3 = vpop.f32.mrb[10].mxu1  ;;  %v1868_v6 = vpop.f32.mrb[11].mxu0  ;;  %3295 = vmatprep.subr.bf16.mxu0 %v5180_v57  ;;  %3377 = vmatprep.subr.bf16.mxu1 %v5183_v53  ;;  %v5295_v57 = vld [vmem:[#allocation9 + $0x20] sm:$0xff]   ;;  %v5296_v53 = vld [vmem:[#allocation9 + $0x68] sm:$0xff]  }
 0x1e3   :  { %v1909_v7 = vpop.f32.mrb[11].mxu1  ;;  %v5205_v59 = vld [vmem:[#allocation8 + $0x100] ss:$24 sps:$4 sm:$0xff]   ;;  %v5210_v60 = vld [vmem:[#allocation8 + $0x134] ss:$24 sps:$4 sm:$0xff]  }
 0x1e4   :  { %v5208_v63 = vld [vmem:[#allocation8 + $0x130] ss:$24 sps:$4 sm:$0xff]   ;;  %v5213_v58 = vld [vmem:[#allocation8 + $0x164] ss:$24 sps:$4 sm:$0xff]   ;;  %v5216_v2 = vld [vmem:[#allocation8 + $0x194] ss:$24 sps:$4 sm:$0xff]  }
 0x1e5   :  { %3296 = vmatpush1.bf16.msra.mxu0 %v5178_v4  ;;  %3378 = vmatpush1.bf16.msra.mxu1 %v5181_v5  ;;  %v5214_v3 = vld [vmem:[#allocation8 + $0x190] ss:$24 sps:$4 sm:$0xff]   ;;  %v5219_v4 = vld [vmem:[#allocation8 + $0x1c4] ss:$24 sps:$4 sm:$0xff]   ;;  %v5217_v5 = vld [vmem:[#allocation8 + $0x1c0] ss:$24 sps:$4 sm:$0xff]  }
 0x1e6   :  { %3297 = vmatprep.subr.bf16.mxu0 %v5186_v8  ;;  %3379 = vmatprep.subr.bf16.mxu1 %v5189_v11  ;;  %v5222_v6 = vld [vmem:[#allocation8 + $0x1f4] ss:$24 sps:$4 sm:$0xff]   ;;  %v5220_v7 = vld [vmem:[#allocation8 + $0x1f0] ss:$24 sps:$4 sm:$0xff]   ;;  %v5225_v8 = vld [vmem:[#allocation8 + $0x224] ss:$24 sps:$4 sm:$0xff]  }
 0x1e7   :  { %v5223_v11 = vld [vmem:[#allocation8 + $0x220] ss:$24 sps:$4 sm:$0xff]  }
 0x1e9   :  { %3298 = vmatpush1.bf16.msra.mxu0 %v5184_v12  ;;  %3380 = vmatpush1.bf16.msra.mxu1 %v5187_v13  ;;  %v5228_v12 = vld [vmem:[#allocation8 + $0x254] ss:$24 sps:$4 sm:$0xff]   ;;  %v5226_v13 = vld [vmem:[#allocation8 + $0x250] ss:$24 sps:$4 sm:$0xff]  }
 0x1ea   :  { %3390 = vmatprep.subr.bf16.mxu0 %v5192_v14  ;;  %4518 = vmatprep.subr.bf16.mxu1 %v5286_v40  ;;  %v5231_v14 = vld [vmem:[#allocation8 + $0x284] ss:$24 sps:$4 sm:$0xff]  }
 0x1eb   :  { %v5300_v40 = vld [vmem:[#allocation9 + $0x78] sm:$0xff]  }
 0x21f   :  { %v1945_v17 = vpop.f32.mrb[12].mxu0 }
 0x220   :  { %v1986_v18 = vpop.f32.mrb[12].mxu1  ;;  %v1946_v19 = vadd.f32 %v1945_v17, %v1905_v62  ;;  %v1947_v23 = vpop.f32.mrb[13].mxu0  ;;  %v5297_v62 = vld [vmem:[#allocation9 + $0x28] sm:$0xff]   ;;  %v5229_v17 = vld [vmem:[#allocation8 + $0x280] ss:$24 sps:$4 sm:$0xff]  }
 0x221   :  { %v1988_v24 = vpop.f32.mrb[13].mxu1  ;;  %v1948_v25 = vadd.f32 %v1947_v23, %v1907_v1  ;;  %v1949_v27 = vpop.f32.mrb[14].mxu0  ;;  %v5211_v1 = vld [vmem:[#allocation8 + $0x160] ss:$24 sps:$4 sm:$0xff]  }
 0x222   :  { %v1990_v28 = vpop.f32.mrb[14].mxu1  ;;  %v1987_v29 = vadd.f32 %v1986_v18, %v1946_v19  ;;  %v1950_v30 = vpop.f32.mrb[15].mxu0  ;;  %v5234_v18 = vld [vmem:[#allocation8 + $0x2b4] ss:$24 sps:$4 sm:$0xff]   ;;  %v5232_v19 = vld [vmem:[#allocation8 + $0x2b0] ss:$24 sps:$4 sm:$0xff]  }
 0x223   :  { %v1991_v31 = vpop.f32.mrb[15].mxu1  ;;  %v1989_v32 = vadd.f32 %v1988_v24, %v1948_v25  ;;  %v5235_v23 = vld [vmem:[#allocation8 + $0x2e0] ss:$24 sps:$4 sm:$0xff]   ;;  %v5240_v24 = vld [vmem:[#allocation8 + $0x314] ss:$24 sps:$4 sm:$0xff]  }
 0x224   :  { %v2032_v33 = vadd.f32 %v2021_v20, %v1987_v29  ;;  %v5237_v20 = vld [vmem:[#allocation8 + $0x2e4] ss:$24 sps:$4 sm:$0xff]   ;;  %v5238_v25 = vld [vmem:[#allocation8 + $0x310] ss:$24 sps:$4 sm:$0xff]   ;;  %v5241_v27 = vld [vmem:[#allocation8 + $0x340] ss:$24 sps:$4 sm:$0xff]  }
 0x225   :  { %v2033_v34 = vadd.f32 %v2025_v26, %v1989_v32  ;;  %v5243_v26 = vld [vmem:[#allocation8 + $0x344] ss:$24 sps:$4 sm:$0xff]   ;;  %v5246_v28 = vld [vmem:[#allocation8 + $0x374] ss:$24 sps:$4 sm:$0xff]   ;;  %v5244_v29 = vld [vmem:[#allocation8 + $0x370] ss:$24 sps:$4 sm:$0xff]  }
 0x226   :  { %v2036_v35 = vmax.f32 %v2032_v33, 0.0  ;;  %v5249_v30 = vld [vmem:[#allocation8 + $0x3a4] ss:$24 sps:$4 sm:$0xff]   ;;  %v5247_v31 = vld [vmem:[#allocation8 + $0x3a0] ss:$24 sps:$4 sm:$0xff]  }
 0x227   :  { %v2037_v36 = vmax.f32 %v2033_v34, 0.0  ;;  %v5252_v32 = vld [vmem:[#allocation8 + $0x3d4] ss:$24 sps:$4 sm:$0xff]   ;;  %v5250_v33 = vld [vmem:[#allocation8 + $0x3d0] ss:$24 sps:$4 sm:$0xff]  }
 0x228   :  { %v5639_v39 = vpack.c.bf16 %v2036_v35, %v2036_v35  ;;  %v5255_v34 = vld [vmem:[#allocation8 + $0x404] ss:$24 sps:$4 sm:$0xff]   ;;  %v5258_v35 = vld [vmem:[#allocation8 + $0x434] ss:$24 sps:$4 sm:$0xff]  }
 0x229   :  { %v5637_v37 = vpack.c.bf16 %v2037_v36, %v2037_v36  ;;  %v5298_v36 = vld [vmem:[#allocation9 + $0x70] sm:$0xff]  }
 0x22b   :  { %3299 = vmatprep.mubr.bf16.mxu0 %v5637_v37  ;;  %3381 = vmatprep.mubr.bf16.mxu1 %v5637_v37 }
 0x22c   :  { %3300 = vmatmul.mubr.bf16.vlgmr.msra.gmra.mrb[16].mxu0 %v5639_v39  ;;  %3382 = vmatmul.mubr.bf16.vlgmr.msra.gmra.mrb[16].mxu1 %v5639_v39 }
 0x22d   :  { %3391 = vmatpush1.bf16.msra.mxu0 %v5190_v38  ;;  %3422 = vmatprep.mubr.bf16.mxu0 %v5621_v61  ;;  %v5204_v61 = vld [vmem:[#allocation8 + $0xd4] ss:$24 sps:$4 sm:$0xff]   ;;  %v5256_v38 = vld [vmem:[#allocation8 + $0x430] ss:$24 sps:$4 sm:$0xff]  }
 0x22e   :  { %3392 = vmatprep.subr.bf16.mxu0 %v5195_v9  ;;  %4519 = vmatpush3.bf16.msra.mxu1 %v5287_v10  ;;  %v5261_v9 = vld [vmem:[#allocation8 + $0x464] ss:$24 sps:$4 sm:$0xff]  }
 0x22f   :  { %4520 = vmatprep.subr.bf16.mxu1 %v5288_v21  ;;  %v5301_v10 = vld [vmem:[#allocation9 + $0x38] sm:$0xff]  }
 0x230   :  { %v5259_v21 = vld [vmem:[#allocation8 + $0x460] ss:$24 sps:$4 sm:$0xff]  }
 0x231   :  { %3393 = vmatpush1.bf16.msra.mxu0 %v5193_v22  ;;  %v5264_v22 = vld [vmem:[#allocation8 + $0x494] ss:$24 sps:$4 sm:$0xff]  }
 0x232   :  { %3394 = vmatprep.subr.bf16.mxu0 %v5198_v43  ;;  %4521 = vmatpush3.bf16.msra.mxu1 %v5289_v42  ;;  %v5302_v43 = vld [vmem:[#allocation9 + $0xc0] sm:$0xff]   ;;  %v5262_v42 = vld [vmem:[#allocation8 + $0x490] ss:$24 sps:$4 sm:$0xff]  }
 0x233   :  { %4522 = vmatprep.subr.bf16.mxu1 %v5290_v44  ;;  %v5267_v44 = vld [vmem:[#allocation8 + $0x4c4] ss:$24 sps:$4 sm:$0xff]  }
 0x235   :  { %3395 = vmatpush1.bf16.msra.mxu0 %v5196_v45  ;;  %v5265_v45 = vld [vmem:[#allocation8 + $0x4c0] ss:$24 sps:$4 sm:$0xff]  }
 0x236   :  { %3396 = vmatprep.subr.bf16.mxu0 %v5201_v46  ;;  %4523 = vmatpush3.bf16.msra.mxu1 %v5291_v47  ;;  %v5270_v46 = vld [vmem:[#allocation8 + $0x4f4] ss:$24 sps:$4 sm:$0xff]   ;;  %v5268_v47 = vld [vmem:[#allocation8 + $0x4f0] ss:$24 sps:$4 sm:$0xff]  }
 0x237   :  { %4524 = vmatprep.subr.bf16.mxu1 %v5292_v48  ;;  %v5273_v48 = vld [vmem:[#allocation8 + $0x524] ss:$24 sps:$4 sm:$0xff]  }
 0x239   :  { %3397 = vmatpush1.bf16.msra.mxu0 %v5199_v49  ;;  %v5271_v49 = vld [vmem:[#allocation8 + $0x520] ss:$24 sps:$4 sm:$0xff]  }
 0x23a   :  { %3398 = vmatprep.subr.bf16.mxu0 %v5204_v61  ;;  %4525 = vmatpush3.bf16.msra.mxu1 %v5293_v50  ;;  %v5276_v61 = vld [vmem:[#allocation8 + $0x554] ss:$24 sps:$4 sm:$0xff]   ;;  %v5274_v50 = vld [vmem:[#allocation8 + $0x550] ss:$24 sps:$4 sm:$0xff]  }
 0x23b   :  { %4526 = vmatprep.subr.bf16.mxu1 %v5294_v51  ;;  %v5279_v51 = vld [vmem:[#allocation8 + $0x584] ss:$24 sps:$4 sm:$0xff]  }
 0x23d   :  { %3399 = vmatpush1.bf16.msra.mxu0 %v5202_v52  ;;  %v5277_v52 = vld [vmem:[#allocation8 + $0x580] ss:$24 sps:$4 sm:$0xff]  }
 0x23e   :  { %3400 = vmatprep.subr.bf16.mxu0 %v5207_v54  ;;  %4527 = vmatpush3.bf16.msra.mxu1 %v5295_v57  ;;  %v5282_v54 = vld [vmem:[#allocation8 + $0x5b4] ss:$24 sps:$4 sm:$0xff]   ;;  %v5280_v57 = vld [vmem:[#allocation8 + $0x5b0] ss:$24 sps:$4 sm:$0xff]  }
 0x23f   :  { %4528 = vmatprep.subr.bf16.mxu1 %v5296_v53  ;;  %v5285_v53 = vld [vmem:[#allocation8 + $0x5e4] ss:$24 sps:$4 sm:$0xff]  }
 0x241   :  { %3401 = vmatpush1.bf16.msra.mxu0 %v5205_v59  ;;  %v5283_v59 = vld [vmem:[#allocation8 + $0x5e0] ss:$24 sps:$4 sm:$0xff]  }
 0x242   :  { %3402 = vmatprep.subr.bf16.mxu0 %v5210_v60  ;;  %4529 = vmatpush3.bf16.msra.mxu1 %v5297_v62  ;;  %v5652_v60 = vld [vmem:[%s5689_s4] sm:$0x3f] }
 0x243   :  { %4530 = vmatprep.subr.bf16.mxu1 %v5298_v36  ;;  %v2239_v62 = vrot.slane %v5652_v60, %v2012_v56 }
 0x245   :  { %3403 = vmatpush1.bf16.msra.mxu0 %v5208_v63  ;;  %v2243_v63 = vrot.slane %v5652_v60, %v2016_v41  ;;  %v5303_v41 = vld [vmem:[#allocation9 + $0x80] sm:$0xff]  }
 0x246   :  { %3404 = vmatprep.subr.bf16.mxu0 %v5213_v58  ;;  %v2251_v58 = vrot.slane %v5652_v60, %v2024_v16  ;;  %v5305_v16 = vld [vmem:[#allocation9 + $0x88] sm:$0xff]  }
 0x249   :  { %3405 = vmatpush1.bf16.msra.mxu0 %v5211_v1 }
 0x24a   :  { %3406 = vmatprep.subr.bf16.mxu0 %v5216_v2 }
 0x24d   :  { %3407 = vmatpush1.bf16.msra.mxu0 %v5214_v3 }
 0x24e   :  { %3408 = vmatprep.subr.bf16.mxu0 %v5219_v4 }
 0x251   :  { %3409 = vmatpush1.bf16.msra.mxu0 %v5217_v5 }
 0x252   :  { %3410 = vmatprep.subr.bf16.mxu0 %v5222_v6 }
 0x255   :  { %3411 = vmatpush1.bf16.msra.mxu0 %v5220_v7 }
 0x256   :  { %3412 = vmatprep.subr.bf16.mxu0 %v5225_v8 }
 0x259   :  { %3413 = vmatpush1.bf16.msra.mxu0 %v5223_v11 }
 0x25a   :  { %3414 = vmatprep.subr.bf16.mxu0 %v5228_v12 }
 0x25d   :  { %3415 = vmatpush1.bf16.msra.mxu0 %v5226_v13 }
 0x25e   :  { %3416 = vmatprep.subr.bf16.mxu0 %v5231_v14 }
 0x261   :  { %3417 = vmatpush1.bf16.msra.mxu0 %v5229_v17 }
 0x262   :  { %3418 = vmatprep.subr.bf16.mxu0 %v5234_v18 }
 0x265   :  { %3419 = vmatpush1.bf16.msra.mxu0 %v5232_v19  ;;  %v5304_v19 = vld [vmem:[#allocation9 + $0xc8] sm:$0xff]  }
 0x266   :  { %3420 = vmatprep.subr.bf16.mxu0 %v5237_v20 }
 0x269   :  { %3421 = vmatpush1.bf16.msra.mxu0 %v5235_v23  ;;  %v5306_v23 = vld [vmem:[#allocation9 + $0xd0] sm:$0xff]  }
 0x26a   :  { %3431 = vmatprep.subr.bf16.mxu0 %v5240_v24  ;;  %v5307_v24 = vld [vmem:[#allocation9 + $0x90] sm:$0xff]  }
 0x26c   :  { %3423 = vmatmul.mubr.bf16.vlgmr.msra.gmra.mrb[20].mxu0 %v5623_v0  ;;  %v5253_v0 = vld [vmem:[#allocation8 + $0x400] ss:$24 sps:$4 sm:$0xff]  }
 0x26d   :  { %3432 = vmatpush1.bf16.msra.mxu0 %v5238_v25  ;;  %3463 = vmatprep.mubr.bf16.mxu0 %v5637_v37  ;;  %v5299_v37 = vld [vmem:[#allocation9 + $0x30] sm:$0xff]   ;;  %v5308_v25 = vld [vmem:[#allocation9 + $0xd8] sm:$0xff]  }
 0x26e   :  { %3433 = vmatprep.subr.bf16.mxu0 %v5243_v26  ;;  %4531 = vmatpush3.bf16.msra.mxu1 %v5299_v37  ;;  %v5309_v26 = vld [vmem:[#allocation9 + $0x98] sm:$0xff]   ;;  %v5318_v37 = vld [vmem:[#allocation9 + $0x140] sm:$0xff]  }
 0x26f   :  { %4532 = vmatprep.subr.bf16.mxu1 %v5300_v40  ;;  %v5320_v40 = vld [vmem:[#allocation9 + $0x148] sm:$0xff]  }
 0x271   :  { %3434 = vmatpush1.bf16.msra.mxu0 %v5241_v27  ;;  %v5310_v27 = vld [vmem:[#allocation9 + $0xe0] sm:$0xff]  }
 0x272   :  { %3435 = vmatprep.subr.bf16.mxu0 %v5246_v28  ;;  %4533 = vmatpush3.bf16.msra.mxu1 %v5301_v10  ;;  %v5311_v28 = vld [vmem:[#allocation9 + $0xa0] sm:$0xff]   ;;  %v5322_v10 = vld [vmem:[#allocation9 + $0x150] sm:$0xff]  }
 0x273   :  { %4540 = vmatprep.subr.bf16.mxu1 %v5302_v43  ;;  %v5325_v43 = vld [vmem:[#allocation9 + $0x118] sm:$0xff]  }
 0x275   :  { %3436 = vmatpush1.bf16.msra.mxu0 %v5244_v29  ;;  %v5312_v29 = vld [vmem:[#allocation9 + $0xe8] sm:$0xff]  }
 0x276   :  { %3437 = vmatprep.subr.bf16.mxu0 %v5249_v30  ;;  %v5313_v30 = vld [vmem:[#allocation9 + $0xa8] sm:$0xff]  }
 0x279   :  { %3438 = vmatpush1.bf16.msra.mxu0 %v5247_v31  ;;  %v2247_v31 = vrot.slane %v5652_v60, %v2020_v15  ;;  %v5321_v15 = vld [vmem:[#allocation9 + $0x108] sm:$0xff]  }
 0x27a   :  { %3439 = vmatprep.subr.bf16.mxu0 %v5252_v32  ;;  %v5314_v32 = vld [vmem:[#allocation9 + $0xf0] sm:$0xff]  }
 0x27d   :  { %3440 = vmatpush1.bf16.msra.mxu0 %v5250_v33  ;;  %v5315_v33 = vld [vmem:[#allocation9 + $0xb0] sm:$0xff]  }
 0x27e   :  { %3441 = vmatprep.subr.bf16.mxu0 %v5255_v34 }
 0x281   :  { %3442 = vmatpush1.bf16.msra.mxu0 %v5253_v0  ;;  %v5316_v0 = vld [vmem:[#allocation9 + $0xf8] sm:$0xff]  }
 0x282   :  { %3443 = vmatprep.subr.bf16.mxu0 %v5258_v35  ;;  %v5317_v35 = vld [vmem:[#allocation9 + $0xb8] sm:$0xff]  }
 0x285   :  { %3444 = vmatpush1.bf16.msra.mxu0 %v5256_v38  ;;  %v5319_v38 = vld [vmem:[#allocation9 + $0x100] sm:$0xff]  }
 0x286   :  { %3445 = vmatprep.subr.bf16.mxu0 %v5261_v9 }
 0x289   :  { %3446 = vmatpush1.bf16.msra.mxu0 %v5259_v21  ;;  %v5323_v21 = vld [vmem:[#allocation9 + $0x110] sm:$0xff]  }
 0x28a   :  { %3447 = vmatprep.subr.bf16.mxu0 %v5264_v22  ;;  %v5324_v22 = vld [vmem:[#allocation9 + $0x158] sm:$0xff]  }
 0x28d   :  { %3448 = vmatpush1.bf16.msra.mxu0 %v5262_v42  ;;  %v5326_v42 = vld [vmem:[#allocation9 + $0x160] sm:$0xff]  }
 0x28e   :  { %3449 = vmatprep.subr.bf16.mxu0 %v5267_v44  ;;  %v5327_v44 = vld [vmem:[#allocation9 + $0x120] sm:$0xff]  }
 0x291   :  { %3450 = vmatpush1.bf16.msra.mxu0 %v5265_v45  ;;  %v5328_v45 = vld [vmem:[#allocation9 + $0x168] sm:$0xff]  }
 0x292   :  { %3451 = vmatprep.subr.bf16.mxu0 %v5270_v46  ;;  %v5329_v46 = vld [vmem:[#allocation9 + $0x128] sm:$0xff]  }
 0x295   :  { %3452 = vmatpush1.bf16.msra.mxu0 %v5268_v47  ;;  %v5330_v47 = vld [vmem:[#allocation9 + $0x170] sm:$0xff]  }
 0x296   :  { %3453 = vmatprep.subr.bf16.mxu0 %v5273_v48  ;;  %v5331_v48 = vld [vmem:[#allocation9 + $0x130] sm:$0xff]  }
 0x299   :  { %3454 = vmatpush1.bf16.msra.mxu0 %v5271_v49  ;;  %v5332_v49 = vld [vmem:[#allocation9 + $0x178] sm:$0xff]  }
 0x29a   :  { %3455 = vmatprep.subr.bf16.mxu0 %v5276_v61  ;;  %v5333_v61 = vld [vmem:[#allocation9 + $0x138] sm:$0xff]  }
 0x29d   :  { %3456 = vmatpush1.bf16.msra.mxu0 %v5274_v50  ;;  %v2254_v50 = vsub.s32 4, %v5604_v55 }
 0x29e   :  { %3457 = vmatprep.subr.bf16.mxu0 %v5279_v51  ;;  %v2258_v51 = vsub.s32 5, %v5604_v55 }
 0x2a1   :  { %3458 = vmatpush1.bf16.msra.mxu0 %v5277_v52  ;;  %v2255_v52 = vrot.slane %v5652_v60, %v2254_v50 }
 0x2a2   :  { %3459 = vmatprep.subr.bf16.mxu0 %v5282_v54  ;;  %v2259_v54 = vrot.slane %v5652_v60, %v2258_v51  ;;  %v4469_v60 = vld [vmem:[%s5691_s6] ss:$0 sm:$0xff] }
 0x2a5   :  { %3460 = vmatpush1.bf16.msra.mxu0 %v5280_v57 }
 0x2a6   :  { %3461 = vmatprep.subr.bf16.mxu0 %v5285_v53 }
 0x2a9   :  { %3462 = vmatpush1.bf16.msra.mxu0 %v5283_v59 }
 0x2ac   :  { %3464 = vmatmul.mubr.bf16.vlgmr.msra.gmra.mrb[20].mxu0 %v5639_v39 }
 0x2ff   :  { %v3301_v1 = vpop.f32.mrb[16].mxu0  ;;  %v3383_v2 = vpop.f32.mrb[16].mxu1 }
 0x300   :  { %v4584_v39 = vadd.f32 %v3301_v1, %v2239_v62  ;;  %v3303_v3 = vpop.f32.mrb[17].mxu0  ;;  %v3385_v4 = vpop.f32.mrb[17].mxu1  ;;  %v4586_v34 = vadd.f32 %v3383_v2, %v2247_v31 }
 0x301   :  { %v4585_v5 = vadd.f32 %v3303_v3, %v2243_v63  ;;  %v4587_v6 = vadd.f32 %v3385_v4, %v2251_v58  ;;  %v3305_v7 = vpop.f32.mrb[18].mxu0  ;;  %v3387_v8 = vpop.f32.mrb[18].mxu1 }
 0x302   :  { %v3472_v11 = vmax.f32 %v4584_v39, 0.0  ;;  %v3306_v12 = vpop.f32.mrb[19].mxu0  ;;  %v3388_v56 = vpop.f32.mrb[19].mxu1  ;;  %v3474_v36 = vmax.f32 %v4586_v34, 0.0 }
 0x303   :  { %v3473_v13 = vmax.f32 %v4585_v5, 0.0  ;;  %v3475_v14 = vmax.f32 %v4587_v6, 0.0 }
 0x304   :  { %v3478_v18 = vpack.c.bf16 %v3472_v11, %v3472_v11  ;;  %v3480_v9 = vpack.c.bf16 %v3474_v36, %v3474_v36 }
 0x305   :  { %v3479_v17 = vpack.c.bf16 %v3473_v13, %v3473_v13  ;;  %v3481_v20 = vpack.c.bf16 %v3475_v14, %v3475_v14 }
 0x307   :  { %3907 = vmatprep.mubr.bf16.mxu1 %v3479_v17 }
 0x308   :  { %3908 = vmatmul.mubr.bf16.vlgmr.msra.gmra.mrb[20].mxu1 %v3478_v18 }
 0x309   :  { %4541 = vmatpush3.bf16.msra.mxu1 %v5303_v41  ;;  %3947 = vmatprep.mubr.bf16.mxu1 %v3481_v20 }
 0x30a   :  { %4542 = vmatprep.subr.bf16.mxu1 %v5304_v19 }
 0x30d   :  { %4543 = vmatpush3.bf16.msra.mxu1 %v5305_v16 }
 0x30e   :  { %4544 = vmatprep.subr.bf16.mxu1 %v5306_v23 }
 0x311   :  { %4545 = vmatpush3.bf16.msra.mxu1 %v5307_v24 }
 0x312   :  { %4546 = vmatprep.subr.bf16.mxu1 %v5308_v25 }
 0x315   :  { %4547 = vmatpush3.bf16.msra.mxu1 %v5309_v26 }
 0x316   :  { %4548 = vmatprep.subr.bf16.mxu1 %v5310_v27 }
 0x319   :  { %4549 = vmatpush3.bf16.msra.mxu1 %v5311_v28 }
 0x31a   :  { %4550 = vmatprep.subr.bf16.mxu1 %v5312_v29 }
 0x31d   :  { %4551 = vmatpush3.bf16.msra.mxu1 %v5313_v30 }
 0x31e   :  { %4552 = vmatprep.subr.bf16.mxu1 %v5314_v32 }
 0x321   :  { %4553 = vmatpush3.bf16.msra.mxu1 %v5315_v33 }
 0x322   :  { %4554 = vmatprep.subr.bf16.mxu1 %v5316_v0 }
 0x325   :  { %4555 = vmatpush3.bf16.msra.mxu1 %v5317_v35 }
 0x326   :  { %4562 = vmatprep.subr.bf16.mxu1 %v5318_v37 }
 0x328   :  { %3948 = vmatmul.mubr.bf16.vlgmr.msra.gmra.mrb[24].mxu1 %v3480_v9 }
 0x329   :  { %4563 = vmatpush3.bf16.msra.mxu1 %v5319_v38 }
 0x32a   :  { %4564 = vmatprep.subr.bf16.mxu1 %v5320_v40 }
 0x32d   :  { %4565 = vmatpush3.bf16.msra.mxu1 %v5321_v15 }
 0x32e   :  { %4566 = vmatprep.subr.bf16.mxu1 %v5322_v10 }
 0x331   :  { %4567 = vmatpush3.bf16.msra.mxu1 %v5323_v21 }
 0x332   :  { %4568 = vmatprep.subr.bf16.mxu1 %v5324_v22 }
 0x335   :  { %4569 = vmatpush3.bf16.msra.mxu1 %v5325_v43 }
 0x336   :  { %4570 = vmatprep.subr.bf16.mxu1 %v5326_v42 }
 0x339   :  { %4571 = vmatpush3.bf16.msra.mxu1 %v5327_v44 }
 0x33a   :  { %4572 = vmatprep.subr.bf16.mxu1 %v5328_v45 }
 0x33d   :  { %4573 = vmatpush3.bf16.msra.mxu1 %v5329_v46 }
 0x33e   :  { %4574 = vmatprep.subr.bf16.mxu1 %v5330_v47 }
 0x341   :  { %4575 = vmatpush3.bf16.msra.mxu1 %v5331_v48 }
 0x342   :  { %4576 = vmatprep.subr.bf16.mxu1 %v5332_v49 }
 0x345   :  { %4577 = vmatpush3.bf16.msra.mxu1 %v5333_v61 }
 0x37f   :  { %v3465_v57 = vpop.f32.mrb[20].mxu0 }
 0x380   :  { %v4588_v53 = vadd.f32 %v3465_v57, %v2255_v52  ;;  %v3467_v59 = vpop.f32.mrb[21].mxu0 }
 0x381   :  { %v4589_v62 = vadd.f32 %v3467_v59, %v2259_v54  ;;  %v3469_v63 = vpop.f32.mrb[22].mxu0 }
 0x382   :  { %v3476_v58 = vmax.f32 %v4588_v53, 0.0  ;;  %v3470_v1 = vpop.f32.mrb[23].mxu0 }
 0x383   :  { %v3477_v2 = vmax.f32 %v4589_v62, 0.0 }
 0x384   :  { %v3482_v3 = vpack.c.bf16 %v3476_v58, %v3476_v58 }
 0x385   :  { %v3483_v39 = vpack.c.bf16 %v3477_v2, %v3477_v2 }
 0x387   :  { %3987 = vmatprep.mubr.bf16.mxu1 %v3483_v39 }
 0x388   :  { %3988 = vmatmul.mubr.bf16.vlgmr.msra.gmra.mrb[28].mxu1 %v3482_v3 }
 0x3db   :  { %v4534_v4 = vpop.f32.mrb[20].mxu1 }
 0x3dc   :  { %v4535_v5 = vpop.f32.mrb[21].mxu1 }
 0x3dd   :  { %v4536_v6 = vadd.f32 %v4535_v5, %v4534_v4  ;;  %v4537_v55 = vpop.f32.mrb[22].mxu1 }
 0x3de   :  { %v4538_v7 = vpop.f32.mrb[23].mxu1 }
 0x3df   :  { %v3910_v12 = vadd.f32 %v4536_v6, %v4469_v60 }
 0x3fb   :  { %v4556_v8 = vpop.f32.mrb[24].mxu1 }
 0x3fc   :  { %v4557_v11 = vpop.f32.mrb[25].mxu1 }
 0x3fd   :  { %v4558_v56 = vadd.f32 %v4557_v11, %v4556_v8  ;;  %v4559_v13 = vpop.f32.mrb[26].mxu1 }
 0x3fe   :  { %v4560_v14 = vpop.f32.mrb[27].mxu1 }
 0x3ff   :  { %v3950_v17 = vadd.f32 %v4558_v56, %v3910_v12 }
 0x45b   :  { %v4578_v41 = vpop.f32.mrb[28].mxu1 }
 0x45c   :  { %v4579_v18 = vpop.f32.mrb[29].mxu1 }
 0x45d   :  { %v4580_v19 = vadd.f32 %v4579_v18, %v4578_v41  ;;  %v4581_v20 = vpop.f32.mrb[30].mxu1 }
 0x45e   :  { %v4582_v16 = vpop.f32.mrb[31].mxu1 }
 0x45f   :  { %v3990_v23 = vadd.f32 %v4580_v19, %v3950_v17 }
 0x461   :  { %3995 = vst [vmem:[#allocation11] sm:$0xff] %v3990_v23 }
 0x462   :  { %5433 = shalt.err (!%p5430_p8)
}
 0x463   :  { %s5434_s12 = scalar_lea.hbm %s5692_s7, 128 }
 0x464   :  { %p5435_p9 = scmp.ne.s32.totalorder %s5692_s7, %s5434_s12  ;;  %p5438_p10 = scmp.lt.u32.totalorder %s5434_s12, %s5692_s7 }
 0x466   :  { %p5440_p11 = pnand %p5438_p10, %p5435_p9 }
 0x468   :  { %5443 = shalt.err (!%p5440_p11)
}
 0x469   :  { %4005 = dma.vmem_to_hbm [thread:$0]  %s4003_s9, 128, %s5692_s7, [#allocation5]  }
 0x46a   :  { %5450 = dma.done.wait [#allocation5], 128  }
 0x46b   :  { %5451 = vsyncadd [#allocation5], 4294967168 }
 0x46c   :  { %4009 = vsyncpa [#allocation4], 1 }
 0x46d   :  { %4010 = vsyncpa [#allocation7], 1 }
 0x46e   :  { %4011 = vsyncpa [#allocation10], 1 }
 0x46f   :  { %4012 = vsyncpa [#allocation5], 1 }

</bundles_post_ra>
